<compile_context>
chip_gen: v7x
topology: tpu7x:2x2x1
jax: 0.10.0
libtpu: 0.0.40
codegen_flags: <defaults>
</compile_context>

<pallas_src>
import math

import jax
import jax.numpy as jnp
from jax import lax
from jax.experimental import pallas as pl
from jax.experimental.pallas import tpu as pltpu

# Small, representative shapes implied by the module's forward pass.
T, B, V, H = 8, 8, 32, 32  # seq_len, batch, vocab_size (in/out dim), hidden


def _bidir_lstm_kernel(
    x_ref, h0c_ref, c0c_ref,
    wxf0, wxb0, whh0, b0,          # layer 0: (V,8H), (V,8H), (2H,8H), (1,8H)
    wxf1, wxb1, whh1, b1,          # layer 1: (2H,8H), (2H,8H), (2H,8H), (1,8H)
    g1, be1, wp, bp,
    pred_ref, hn_ref, cn_ref,
    gx_s, l1_s,
):
    TB = x_ref.shape[0]
    _, Bn, Hn = hn_ref.shape
    Tn = TB // Bn
    H2, H4, H6, H8 = 2 * Hn, 4 * Hn, 6 * Hn, 8 * Hn

    # ---- LayerNorm 0 (eps=1e-3): gamma/beta were folded into wxf0/wxb0/b0 host-side,
    # so only the centering + rsqrt remain in-kernel.
    xv = x_ref[...]
    mu = jnp.mean(xv, axis=-1, keepdims=True)
    var = jnp.mean(jnp.square(xv - mu), axis=-1, keepdims=True)
    xc = (xv - mu) * lax.rsqrt(var + 1e-3)

    # ---- Hoisted layer-0 input projection into the combined interleaved gate layout.
    # Row block s of gx = fwd gates of x(s) + bwd gates of x(T-1-s) + bias, so the
    # recurrence touches exactly ONE (8, 8H) slab per step.
    ga = jnp.dot(xc, wxf0[...], preferred_element_type=jnp.float32)
    gb = jnp.dot(xc, wxb0[...], preferred_element_type=jnp.float32)
    bv = b0[...]
    for r in range(Tn):                        # static, fully hoisted off the recurrence
        gx_s[r * Bn:(r + 1) * Bn, :] = (ga[r * Bn:(r + 1) * Bn, :]
                                        + gb[(Tn - 1 - r) * Bn:(Tn - r) * Bn, :] + bv)

    def fused_layer(whh_ref, h_comb, c_comb, store_l1):
        """One bidirectional layer with combined (B, 2H) [fwd|bwd] state.

        Gate columns are interleaved [i_f i_b | f_f f_b | g_f g_b | o_f o_b] with i/f/o
        pre-scaled by 0.5 host-side: one tanh per step gives every gate."""
        w = whh_ref[...]                       # (2H, 8H) block-diagonal recurrence weights
        for s in range(Tn):                    # static unroll (T is small & static)
            gates = (gx_s[s * Bn:(s + 1) * Bn, :]
                     + jnp.dot(h_comb, w, preferred_element_type=jnp.float32))
            t = jnp.tanh(gates)                # single full-width EUP pass
            u = 0.5 * t + 0.5                  # sigmoid() of the pre-scaled i/f/o columns
            c_comb = u[:, H2:H4] * c_comb + u[:, 0:H2] * t[:, H4:H6]
            h_comb = u[:, H6:H8] * jnp.tanh(c_comb)
            if store_l1:
                tb = Tn - 1 - s
                l1_s[s * Bn:(s + 1) * Bn, 0:Hn] = h_comb[:, 0:Hn]        # o0_fwd(s)
                l1_s[tb * Bn:(tb + 1) * Bn, Hn:H2] = h_comb[:, Hn:H2]    # o0_bwd(T-1-s)
        return h_comb, c_comb

    # ---- Layer 0 (both directions fused) ----
    h0c, c0c = fused_layer(whh0, h0c_ref[0], c0c_ref[0], True)

    # ---- Hoisted layer-1 input projection from the single (T*B, 2H) layer-0 buffer ----
    # TODO(synk): nn.LSTM inter-layer dropout(p=0.3) applies only in train mode; eval semantics here.
    l1 = l1_s[...]
    ga1 = jnp.dot(l1, wxf1[...], preferred_element_type=jnp.float32)
    gb1 = jnp.dot(l1, wxb1[...], preferred_element_type=jnp.float32)
    b1v = b1[...]
    for r in range(Tn):
        gx_s[r * Bn:(r + 1) * Bn, :] = (ga1[r * Bn:(r + 1) * Bn, :]
                                        + gb1[(Tn - 1 - r) * Bn:(Tn - r) * Bn, :] + b1v)

    # ---- Layer 1 (both directions fused; no per-step outputs needed) ----
    # TODO(synk): on v7x the two direction chains could be split across the two TensorCores
    # (pl.core_map + VMEM_SHARED handoff), but the whole kernel is only a few µs — skipped.
    h1c, c1c = fused_layer(whh1, h0c_ref[1], c0c_ref[1], False)

    hn_ref[0] = h0c[:, 0:Hn]
    hn_ref[1] = h0c[:, Hn:H2]
    hn_ref[2] = h1c[:, 0:Hn]
    hn_ref[3] = h1c[:, Hn:H2]
    cn_ref[0] = c0c[:, 0:Hn]
    cn_ref[1] = c0c[:, Hn:H2]
    cn_ref[2] = c1c[:, 0:Hn]
    cn_ref[3] = c1c[:, Hn:H2]

    # bmerge = [final fwd h of layer 1 | final bwd h of layer 1] == the combined state h1c.
    # LayerNorm 1 (eps=1e-3) + prediction matmul, directly on the (B, 2H) slab.
    mu1 = jnp.mean(h1c, axis=-1, keepdims=True)
    d = h1c - mu1
    var1 = jnp.mean(d * d, axis=-1, keepdims=True)
    n1 = d * lax.rsqrt(var1 + 1e-3) * g1[...] + be1[...]
    pred_ref[...] = jnp.dot(n1, wp[...], preferred_element_type=jnp.float32) + bp[...]


def _interleave_gate_cols(m_f, m_b, h):
    """Pack two (rows, 4H) gate matrices into (rows, 8H) with columns
    [i_f i_b | f_f f_b | g_f g_b | o_f o_b]."""
    rows = m_f.shape[0]
    stacked = jnp.stack([m_f.reshape(rows, 4, h), m_b.reshape(rows, 4, h)], axis=2)
    return stacked.reshape(rows, 8 * h)


def _pack_layer(wih_f, whh_f, b_f, wih_b, whh_b, b_b, h):
    """Host-side packing of one bidirectional layer:
       * scale i/f/o gate columns by 0.5 (tanh-only gate trick),
       * interleave fwd/bwd gate columns,
       * block-diagonal (2H, 8H) recurrence matrix,
       * separate input matrices for the natural-time (fwd) and time-reversed (bwd) paths."""
    scale = jnp.concatenate([jnp.full((h,), 0.5), jnp.full((h,), 0.5),
                             jnp.ones((h,)), jnp.full((h,), 0.5)]).astype(jnp.float32)
    wih_f, wih_b = wih_f * scale, wih_b * scale
    whh_f, whh_b = whh_f * scale, whh_b * scale
    b_f, b_b = b_f * scale, b_b * scale

    zeros_ih = jnp.zeros_like(wih_f)
    wxf = _interleave_gate_cols(wih_f, zeros_ih, h)       # (in, 8H), bwd columns zero
    wxb = _interleave_gate_cols(zeros_ih, wih_b, h)       # (in, 8H), fwd columns zero
    zeros_hh = jnp.zeros_like(whh_f)
    whh = _interleave_gate_cols(jnp.concatenate([whh_f, zeros_hh], axis=0),
                                jnp.concatenate([zeros_hh, whh_b], axis=0), h)  # (2H, 8H)
    b = _interleave_gate_cols(b_f, b_b, h)                # (1, 8H)
    return wxf, wxb, whh, b


def bidir_lstm_forward(x, h0, c0, params):
    """Runs the whole forward pass in one Pallas kernel (grid=()); all operands in VMEM."""
    (wih0f, whh0f, b0f, wih0b, whh0b, b0b,
     wih1f, whh1f, b1f, wih1b, whh1b, b1b,
     g0, be0, g1, be1, wp, bp) = params

    wxf0, wxb0, whh0c, b0c = _pack_layer(wih0f, whh0f, b0f, wih0b, whh0b, b0b, H)
    wxf1, wxb1, whh1c, b1c = _pack_layer(wih1f, whh1f, b1f, wih1b, whh1b, b1b, H)

    # Fold LayerNorm-0 gamma/beta into the layer-0 input projection:
    #   xn @ W = xc @ (diag(g0) @ W) + be0 @ W    with xc = centered/normalized x.
    b0c = b0c + be0 @ wxf0 + be0 @ wxb0
    wxf0 = wxf0 * g0.reshape(-1, 1)
    wxb0 = wxb0 * g0.reshape(-1, 1)

    # Layout plumbing (host-side): flatten time into rows; initial states into the
    # combined per-layer [fwd|bwd] layout the kernel carries.
    x_flat = x.reshape(T * B, V)
    h0c = h0.reshape(2, 2, B, H).transpose(0, 2, 1, 3).reshape(2, B, 2 * H)
    c0c = c0.reshape(2, 2, B, H).transpose(0, 2, 1, 3).reshape(2, B, 2 * H)

    kernel_args = (x_flat, h0c, c0c,
                   wxf0, wxb0, whh0c, b0c,
                   wxf1, wxb1, whh1c, b1c,
                   g1, be1, wp, bp)

    vmem = lambda: pl.BlockSpec(memory_space=pltpu.MemorySpace.VMEM)
    out_shapes = (
        jax.ShapeDtypeStruct((B, V), jnp.float32),      # pred
        jax.ShapeDtypeStruct((4, B, H), jnp.float32),   # h_n
        jax.ShapeDtypeStruct((4, B, H), jnp.float32),   # c_n
    )
    return pl.pallas_call(
        _bidir_lstm_kernel,
        out_shape=out_shapes,
        in_specs=[vmem() for _ in range(len(kernel_args))],
        out_specs=(vmem(), vmem(), vmem()),
        scratch_shapes=[
            pltpu.VMEM((T * B, 8 * H), jnp.float32),   # combined input-side gates (reused L0/L1)
            pltpu.VMEM((T * B, 2 * H), jnp.float32),   # layer-0 outputs [o0f | o0b] per timestep
        ],
        cost_estimate=pl.CostEstimate(flops=10_500_000, transcendentals=41_000,
                                      bytes_accessed=360_000),
    )(*kernel_args)


def init_params(key):
    """Deterministic synthetic parameters (shapes match the PyTorch module)."""
    keys = jax.random.split(key, 9)

    def xavier(k, fan_in, fan_out):
        lim = math.sqrt(6.0 / (fan_in + fan_out))
        return jax.random.uniform(k, (fan_in, fan_out), jnp.float32, -lim, lim)

    def unif(k, shape, scale):
        return jax.random.uniform(k, shape, jnp.float32, -scale, scale)

    sh = 1.0 / math.sqrt(H)
    # Combined (b_ih + b_hh): forget-gate slice set to 1.0 in each -> 2.0 combined.
    bias = jnp.concatenate([jnp.zeros(H), 2.0 * jnp.ones(H),
                            jnp.zeros(H), jnp.zeros(H)]).reshape(1, 4 * H)

    # TODO(synk): torch uses orthogonal init for weight_hh_*; synthetic uniform used here.
    wih0f = xavier(keys[0], V, 4 * H)
    whh0f = unif(keys[1], (H, 4 * H), sh)
    wih0b = xavier(keys[2], V, 4 * H)
    whh0b = unif(keys[3], (H, 4 * H), sh)
    wih1f = xavier(keys[4], 2 * H, 4 * H)
    whh1f = unif(keys[5], (H, 4 * H), sh)
    wih1b = xavier(keys[6], 2 * H, 4 * H)
    whh1b = unif(keys[7], (H, 4 * H), sh)

    g0, be0 = jnp.ones((1, V), jnp.float32), jnp.zeros((1, V), jnp.float32)
    g1, be1 = jnp.ones((1, 2 * H), jnp.float32), jnp.zeros((1, 2 * H), jnp.float32)
    wp = xavier(keys[8], 2 * H, V)
    bp = jnp.zeros((1, V), jnp.float32)

    return (wih0f, whh0f, bias, wih0b, whh0b, bias,
            wih1f, whh1f, bias, wih1b, whh1b, bias,
            g0, be0, g1, be1, wp, bp)


def reference(x, h0, c0, params):
    """Pure-JAX reference with identical semantics, for validation."""
    (wih0f, whh0f, b0f, wih0b, whh0b, b0b,
     wih1f, whh1f, b1f, wih1b, whh1b, b1b,
     g0, be0, g1, be1, wp, bp) = params

    def ln(v, g, b_, eps=1e-3):
        mu = v.mean(-1, keepdims=True)
        var = ((v - mu) ** 2).mean(-1, keepdims=True)
        return (v - mu) / jnp.sqrt(var + eps) * g + b_

    def cell(w_ih, w_hh, b, h, c, xt):
        gates = xt @ w_ih + h @ w_hh + b
        i_g, f_g, g_g, o_g = jnp.split(gates, 4, axis=-1)
        i_g, f_g, o_g = jax.nn.sigmoid(i_g), jax.nn.sigmoid(f_g), jax.nn.sigmoid(o_g)
        g_g = jnp.tanh(g_g)
        c = f_g * c + i_g * g_g
        h = o_g * jnp.tanh(c)
        return h, c

    def run(seq, w_ih, w_hh, b, h, c, reverse):
        it = seq[::-1] if reverse else seq

        def step(carry, xt):
            h, c = cell(w_ih, w_hh, b, *carry, xt)
            return (h, c), h

        (h, c), outs = lax.scan(step, (h, c), it)
        if reverse:
            outs = outs[::-1]
        return outs, h, c

    xn = ln(x, g0, be0)
    o0f, h0f, c0f = run(xn, wih0f, whh0f, b0f, h0[0], c0[0], False)
    o0b, h0b, c0b = run(xn, wih0b, whh0b, b0b, h0[1], c0[1], True)
    l1in = jnp.concatenate([o0f, o0b], axis=-1)
    o1f, h1f, c1f = run(l1in, wih1f, whh1f, b1f, h0[2], c0[2], False)
    o1b, h1b, c1b = run(l1in, wih1b, whh1b, b1b, h0[3], c0[3], True)
    bmerge = jnp.concatenate([o1f[-1], o1b[0]], axis=-1)
    pred = ln(bmerge, g1, be1) @ wp + bp
    hn = jnp.stack([h0f, h0b, h1f, h1b])
    cn = jnp.stack([c0f, c0b, c1f, c1b])
    return pred, hn, cn


if __name__ == "__main__":
    key = jax.random.PRNGKey(0)
    kx, kp = jax.random.split(key)

    x = jax.random.normal(kx, (T, B, V), jnp.float32)         # (seq, batch, vocab)
    h0 = jnp.zeros((4, B, H), jnp.float32)                     # new_sequence() hidden
    c0 = jnp.zeros((4, B, H), jnp.float32)
    params = init_params(kp)

    # next_prediction='left' corresponds to x = jnp.flip(x, 0) before calling (host glue).
    pred, hn, cn = jax.jit(bidir_lstm_forward)(x, h0, c0, params)
    jax.block_until_ready((pred, hn, cn))

    pred_r, hn_r, cn_r = reference(x, h0, c0, params)
    assert jnp.allclose(pred, pred_r, atol=1e-4, rtol=1e-4)
    assert jnp.allclose(hn, hn_r, atol=1e-4, rtol=1e-4)
    assert jnp.allclose(cn, cn_r, atol=1e-4, rtol=1e-4)

    print("KERNEL_OK")
</pallas_src>

<mosaic_0001>
module attributes {stable_mosaic.version = 11 : i64} {
  func.func @_bidir_lstm_kernel(%arg0: memref<64x32xf32, #tpu.memory_space<vmem>>, %arg1: memref<2x8x64xf32, #tpu.memory_space<vmem>>, %arg2: memref<2x8x64xf32, #tpu.memory_space<vmem>>, %arg3: memref<32x256xf32, #tpu.memory_space<vmem>>, %arg4: memref<32x256xf32, #tpu.memory_space<vmem>>, %arg5: memref<64x256xf32, #tpu.memory_space<vmem>>, %arg6: memref<1x256xf32, #tpu.memory_space<vmem>>, %arg7: memref<64x256xf32, #tpu.memory_space<vmem>>, %arg8: memref<64x256xf32, #tpu.memory_space<vmem>>, %arg9: memref<64x256xf32, #tpu.memory_space<vmem>>, %arg10: memref<1x256xf32, #tpu.memory_space<vmem>>, %arg11: memref<1x64xf32, #tpu.memory_space<vmem>>, %arg12: memref<1x64xf32, #tpu.memory_space<vmem>>, %arg13: memref<64x32xf32, #tpu.memory_space<vmem>>, %arg14: memref<1x32xf32, #tpu.memory_space<vmem>>, %arg15: memref<8x32xf32, #tpu.memory_space<vmem>>, %arg16: memref<4x8x32xf32, #tpu.memory_space<vmem>>, %arg17: memref<4x8x32xf32, #tpu.memory_space<vmem>>, %arg18: memref<64x256xf32, #tpu.memory_space<vmem>>, %arg19: memref<64x64xf32, #tpu.memory_space<vmem>>) attributes {dimension_semantics = [], scalar_prefetch = 0 : i64, scratch_operands = 2 : i64, tpu.core_type = #tpu.core_type<tc>} {
    %c0 = arith.constant 0 : index
    %c0_0 = arith.constant 0 : index
    %0 = vector.load %arg0[%c0, %c0_0] : memref<64x32xf32, #tpu.memory_space<vmem>>, vector<64x32xf32>
    %cst = arith.constant dense<0.000000e+00> : vector<64xf32>
    %1 = vector.multi_reduction <add>, %0, %cst [1] : vector<64x32xf32> to vector<64xf32>
    %2 = vector.shape_cast %1 : vector<64xf32> to vector<64x1xf32>
    %cst_1 = arith.constant 3.200000e+01 : f32
    %3 = vector.broadcast %cst_1 : f32 to vector<64x1xf32>
    %4 = arith.divf %2, %3 : vector<64x1xf32>
    %5 = vector.broadcast %4 : vector<64x1xf32> to vector<64x32xf32>
    %6 = arith.subf %0, %5 : vector<64x32xf32>
    %7 = arith.mulf %6, %6 : vector<64x32xf32>
    %cst_2 = arith.constant dense<0.000000e+00> : vector<64xf32>
    %8 = vector.multi_reduction <add>, %7, %cst_2 [1] : vector<64x32xf32> to vector<64xf32>
    %9 = vector.shape_cast %8 : vector<64xf32> to vector<64x1xf32>
    %cst_3 = arith.constant 3.200000e+01 : f32
    %10 = vector.broadcast %cst_3 : f32 to vector<64x1xf32>
    %11 = arith.divf %9, %10 : vector<64x1xf32>
    %12 = vector.broadcast %4 : vector<64x1xf32> to vector<64x32xf32>
    %13 = arith.subf %0, %12 : vector<64x32xf32>
    %cst_4 = arith.constant 1.000000e-03 : f32
    %14 = vector.broadcast %cst_4 : f32 to vector<64x1xf32>
    %15 = arith.addf %11, %14 : vector<64x1xf32>
    %16 = math.rsqrt %15 : vector<64x1xf32>
    %17 = vector.broadcast %16 : vector<64x1xf32> to vector<64x32xf32>
    %18 = arith.mulf %13, %17 : vector<64x32xf32>
    %c0_5 = arith.constant 0 : index
    %c0_6 = arith.constant 0 : index
    %19 = vector.load %arg3[%c0_5, %c0_6] : memref<32x256xf32, #tpu.memory_space<vmem>>, vector<32x256xf32>
    %cst_7 = arith.constant dense<0.000000e+00> : vector<64x256xf32>
    %20 = tpu.matmul %18, %19, %cst_7 {dimension_numbers = #tpu.dot_dimension_numbers<[1], [0], [0], [1], [0, 0, 1, 1], [], []>} : vector<64x32xf32>, vector<32x256xf32>, vector<64x256xf32> -> vector<64x256xf32>
    %c0_8 = arith.constant 0 : index
    %c0_9 = arith.constant 0 : index
    %21 = vector.load %arg4[%c0_8, %c0_9] : memref<32x256xf32, #tpu.memory_space<vmem>>, vector<32x256xf32>
    %cst_10 = arith.constant dense<0.000000e+00> : vector<64x256xf32>
    %22 = tpu.matmul %18, %21, %cst_10 {dimension_numbers = #tpu.dot_dimension_numbers<[1], [0], [0], [1], [0, 0, 1, 1], [], []>} : vector<64x32xf32>, vector<32x256xf32>, vector<64x256xf32> -> vector<64x256xf32>
    %c0_11 = arith.constant 0 : index
    %c0_12 = arith.constant 0 : index
    %23 = vector.load %arg6[%c0_11, %c0_12] : memref<1x256xf32, #tpu.memory_space<vmem>>, vector<1x256xf32>
    %24 = vector.extract_strided_slice %20 {offsets = [0, 0], sizes = [8, 256], strides = [1, 1]} : vector<64x256xf32> to vector<8x256xf32>
    %25 = vector.extract_strided_slice %22 {offsets = [56, 0], sizes = [8, 256], strides = [1, 1]} : vector<64x256xf32> to vector<8x256xf32>
    %26 = arith.addf %24, %25 : vector<8x256xf32>
    %27 = vector.broadcast %23 : vector<1x256xf32> to vector<8x256xf32>
    %28 = arith.addf %26, %27 : vector<8x256xf32>
    %c0_13 = arith.constant 0 : index
    %c0_14 = arith.constant 0 : index
    %29 = vector.load %arg18[%c0_13, %c0_14] : memref<64x256xf32, #tpu.memory_space<vmem>>, vector<8x256xf32>
    tpu.vector_store %arg18[%c0_13, %c0_14], %28 {strides = array<i32>} : memref<64x256xf32, #tpu.memory_space<vmem>>, vector<8x256xf32>,
    %30 = vector.extract_strided_slice %20 {offsets = [8, 0], sizes = [8, 256], strides = [1, 1]} : vector<64x256xf32> to vector<8x256xf32>
    %31 = vector.extract_strided_slice %22 {offsets = [48, 0], sizes = [8, 256], strides = [1, 1]} : vector<64x256xf32> to vector<8x256xf32>
    %32 = arith.addf %30, %31 : vector<8x256xf32>
    %33 = vector.broadcast %23 : vector<1x256xf32> to vector<8x256xf32>
    %34 = arith.addf %32, %33 : vector<8x256xf32>
    %c8 = arith.constant 8 : index
    %c0_15 = arith.constant 0 : index
    %35 = vector.load %arg18[%c8, %c0_15] : memref<64x256xf32, #tpu.memory_space<vmem>>, vector<8x256xf32>
    tpu.vector_store %arg18[%c8, %c0_15], %34 {strides = array<i32>} : memref<64x256xf32, #tpu.memory_space<vmem>>, vector<8x256xf32>,
    %36 = vector.extract_strided_slice %20 {offsets = [16, 0], sizes = [8, 256], strides = [1, 1]} : vector<64x256xf32> to vector<8x256xf32>
    %37 = vector.extract_strided_slice %22 {offsets = [40, 0], sizes = [8, 256], strides = [1, 1]} : vector<64x256xf32> to vector<8x256xf32>
    %38 = arith.addf %36, %37 : vector<8x256xf32>
    %39 = vector.broadcast %23 : vector<1x256xf32> to vector<8x256xf32>
    %40 = arith.addf %38, %39 : vector<8x256xf32>
    %c16 = arith.constant 16 : index
    %c0_16 = arith.constant 0 : index
    %41 = vector.load %arg18[%c16, %c0_16] : memref<64x256xf32, #tpu.memory_space<vmem>>, vector<8x256xf32>
    tpu.vector_store %arg18[%c16, %c0_16], %40 {strides = array<i32>} : memref<64x256xf32, #tpu.memory_space<vmem>>, vector<8x256xf32>,
    %42 = vector.extract_strided_slice %20 {offsets = [24, 0], sizes = [8, 256], strides = [1, 1]} : vector<64x256xf32> to vector<8x256xf32>
    %43 = vector.extract_strided_slice %22 {offsets = [32, 0], sizes = [8, 256], strides = [1, 1]} : vector<64x256xf32> to vector<8x256xf32>
    %44 = arith.addf %42, %43 : vector<8x256xf32>
    %45 = vector.broadcast %23 : vector<1x256xf32> to vector<8x256xf32>
    %46 = arith.addf %44, %45 : vector<8x256xf32>
    %c24 = arith.constant 24 : index
    %c0_17 = arith.constant 0 : index
    %47 = vector.load %arg18[%c24, %c0_17] : memref<64x256xf32, #tpu.memory_space<vmem>>, vector<8x256xf32>
    tpu.vector_store %arg18[%c24, %c0_17], %46 {strides = array<i32>} : memref<64x256xf32, #tpu.memory_space<vmem>>, vector<8x256xf32>,
    %48 = vector.extract_strided_slice %20 {offsets = [32, 0], sizes = [8, 256], strides = [1, 1]} : vector<64x256xf32> to vector<8x256xf32>
    %49 = vector.extract_strided_slice %22 {offsets = [24, 0], sizes = [8, 256], strides = [1, 1]} : vector<64x256xf32> to vector<8x256xf32>
    %50 = arith.addf %48, %49 : vector<8x256xf32>
    %51 = vector.broadcast %23 : vector<1x256xf32> to vector<8x256xf32>
    %52 = arith.addf %50, %51 : vector<8x256xf32>
    %c32 = arith.constant 32 : index
    %c0_18 = arith.constant 0 : index
    %53 = vector.load %arg18[%c32, %c0_18] : memref<64x256xf32, #tpu.memory_space<vmem>>, vector<8x256xf32>
    tpu.vector_store %arg18[%c32, %c0_18], %52 {strides = array<i32>} : memref<64x256xf32, #tpu.memory_space<vmem>>, vector<8x256xf32>,
    %54 = vector.extract_strided_slice %20 {offsets = [40, 0], sizes = [8, 256], strides = [1, 1]} : vector<64x256xf32> to vector<8x256xf32>
    %55 = vector.extract_strided_slice %22 {offsets = [16, 0], sizes = [8, 256], strides = [1, 1]} : vector<64x256xf32> to vector<8x256xf32>
    %56 = arith.addf %54, %55 : vector<8x256xf32>
    %57 = vector.broadcast %23 : vector<1x256xf32> to vector<8x256xf32>
    %58 = arith.addf %56, %57 : vector<8x256xf32>
    %c40 = arith.constant 40 : index
    %c0_19 = arith.constant 0 : index
    %59 = vector.load %arg18[%c40, %c0_19] : memref<64x256xf32, #tpu.memory_space<vmem>>, vector<8x256xf32>
    tpu.vector_store %arg18[%c40, %c0_19], %58 {strides = array<i32>} : memref<64x256xf32, #tpu.memory_space<vmem>>, vector<8x256xf32>,
    %60 = vector.extract_strided_slice %20 {offsets = [48, 0], sizes = [8, 256], strides = [1, 1]} : vector<64x256xf32> to vector<8x256xf32>
    %61 = vector.extract_strided_slice %22 {offsets = [8, 0], sizes = [8, 256], strides = [1, 1]} : vector<64x256xf32> to vector<8x256xf32>
    %62 = arith.addf %60, %61 : vector<8x256xf32>
    %63 = vector.broadcast %23 : vector<1x256xf32> to vector<8x256xf32>
    %64 = arith.addf %62, %63 : vector<8x256xf32>
    %c48 = arith.constant 48 : index
    %c0_20 = arith.constant 0 : index
    %65 = vector.load %arg18[%c48, %c0_20] : memref<64x256xf32, #tpu.memory_space<vmem>>, vector<8x256xf32>
    tpu.vector_store %arg18[%c48, %c0_20], %64 {strides = array<i32>} : memref<64x256xf32, #tpu.memory_space<vmem>>, vector<8x256xf32>,
    %66 = vector.extract_strided_slice %20 {offsets = [56, 0], sizes = [8, 256], strides = [1, 1]} : vector<64x256xf32> to vector<8x256xf32>
    %67 = vector.extract_strided_slice %22 {offsets = [0, 0], sizes = [8, 256], strides = [1, 1]} : vector<64x256xf32> to vector<8x256xf32>
    %68 = arith.addf %66, %67 : vector<8x256xf32>
    %69 = vector.broadcast %23 : vector<1x256xf32> to vector<8x256xf32>
    %70 = arith.addf %68, %69 : vector<8x256xf32>
    %c56 = arith.constant 56 : index
    %c0_21 = arith.constant 0 : index
    %71 = vector.load %arg18[%c56, %c0_21] : memref<64x256xf32, #tpu.memory_space<vmem>>, vector<8x256xf32>
    tpu.vector_store %arg18[%c56, %c0_21], %70 {strides = array<i32>} : memref<64x256xf32, #tpu.memory_space<vmem>>, vector<8x256xf32>,
    %c0_22 = arith.constant 0 : index
    %c0_23 = arith.constant 0 : index
    %c0_24 = arith.constant 0 : index
    %72 = vector.load %arg1[%c0_22, %c0_23, %c0_24] : memref<2x8x64xf32, #tpu.memory_space<vmem>>, vector<1x8x64xf32>
    %73 = vector.shape_cast %72 : vector<1x8x64xf32> to vector<8x64xf32>
    %c0_25 = arith.constant 0 : index
    %c0_26 = arith.constant 0 : index
    %c0_27 = arith.constant 0 : index
    %74 = vector.load %arg2[%c0_25, %c0_26, %c0_27] : memref<2x8x64xf32, #tpu.memory_space<vmem>>, vector<1x8x64xf32>
    %75 = vector.shape_cast %74 : vector<1x8x64xf32> to vector<8x64xf32>
    %c0_28 = arith.constant 0 : index
    %c0_29 = arith.constant 0 : index
    %76 = vector.load %arg5[%c0_28, %c0_29] : memref<64x256xf32, #tpu.memory_space<vmem>>, vector<64x256xf32>
    %c0_30 = arith.constant 0 : index
    %c0_31 = arith.constant 0 : index
    %77 = vector.load %arg18[%c0_30, %c0_31] : memref<64x256xf32, #tpu.memory_space<vmem>>, vector<8x256xf32>
    %cst_32 = arith.constant dense<0.000000e+00> : vector<8x256xf32>
    %78 = tpu.matmul %73, %76, %cst_32 {dimension_numbers = #tpu.dot_dimension_numbers<[1], [0], [0], [1], [0, 0, 1, 1], [], []>} : vector<8x64xf32>, vector<64x256xf32>, vector<8x256xf32> -> vector<8x256xf32>
    %79 = arith.addf %77, %78 : vector<8x256xf32>
    %80 = math.tanh %79 : vector<8x256xf32>
    %cst_33 = arith.constant 5.000000e-01 : f32
    %81 = vector.broadcast %cst_33 : f32 to vector<8x256xf32>
    %82 = arith.mulf %81, %80 : vector<8x256xf32>
    %cst_34 = arith.constant 5.000000e-01 : f32
    %83 = vector.broadcast %cst_34 : f32 to vector<8x256xf32>
    %84 = arith.addf %82, %83 : vector<8x256xf32>
    %85 = vector.extract_strided_slice %84 {offsets = [0, 64], sizes = [8, 64], strides = [1, 1]} : vector<8x256xf32> to vector<8x64xf32>
    %86 = arith.mulf %85, %75 : vector<8x64xf32>
    %87 = vector.extract_strided_slice %84 {offsets = [0, 0], sizes = [8, 64], strides = [1, 1]} : vector<8x256xf32> to vector<8x64xf32>
    %88 = vector.extract_strided_slice %80 {offsets = [0, 128], sizes = [8, 64], strides = [1, 1]} : vector<8x256xf32> to vector<8x64xf32>
    %89 = arith.mulf %87, %88 : vector<8x64xf32>
    %90 = arith.addf %86, %89 : vector<8x64xf32>
    %91 = vector.extract_strided_slice %84 {offsets = [0, 192], sizes = [8, 64], strides = [1, 1]} : vector<8x256xf32> to vector<8x64xf32>
    %92 = math.tanh %90 : vector<8x64xf32>
    %93 = arith.mulf %91, %92 : vector<8x64xf32>
    %94 = vector.extract_strided_slice %93 {offsets = [0, 0], sizes = [8, 32], strides = [1, 1]} : vector<8x64xf32> to vector<8x32xf32>
    %c0_35 = arith.constant 0 : index
    %c0_36 = arith.constant 0 : index
    %95 = vector.load %arg19[%c0_35, %c0_36] : memref<64x64xf32, #tpu.memory_space<vmem>>, vector<8x32xf32>
    tpu.vector_store %arg19[%c0_35, %c0_36], %94 {strides = array<i32>} : memref<64x64xf32, #tpu.memory_space<vmem>>, vector<8x32xf32>,
    %96 = vector.extract_strided_slice %93 {offsets = [0, 32], sizes = [8, 32], strides = [1, 1]} : vector<8x64xf32> to vector<8x32xf32>
    %c56_37 = arith.constant 56 : index
    %c32_38 = arith.constant 32 : index
    %97 = vector.load %arg19[%c56_37, %c32_38] : memref<64x64xf32, #tpu.memory_space<vmem>>, vector<8x32xf32>
    tpu.vector_store %arg19[%c56_37, %c32_38], %96 {strides = array<i32>} : memref<64x64xf32, #tpu.memory_space<vmem>>, vector<8x32xf32>,
    %c8_39 = arith.constant 8 : index
    %c0_40 = arith.constant 0 : index
    %98 = vector.load %arg18[%c8_39, %c0_40] : memref<64x256xf32, #tpu.memory_space<vmem>>, vector<8x256xf32>
    %cst_41 = arith.constant dense<0.000000e+00> : vector<8x256xf32>
    %99 = tpu.matmul %93, %76, %cst_41 {dimension_numbers = #tpu.dot_dimension_numbers<[1], [0], [0], [1], [0, 0, 1, 1], [], []>} : vector<8x64xf32>, vector<64x256xf32>, vector<8x256xf32> -> vector<8x256xf32>
    %100 = arith.addf %98, %99 : vector<8x256xf32>
    %101 = math.tanh %100 : vector<8x256xf32>
    %cst_42 = arith.constant 5.000000e-01 : f32
    %102 = vector.broadcast %cst_42 : f32 to vector<8x256xf32>
    %103 = arith.mulf %102, %101 : vector<8x256xf32>
    %cst_43 = arith.constant 5.000000e-01 : f32
    %104 = vector.broadcast %cst_43 : f32 to vector<8x256xf32>
    %105 = arith.addf %103, %104 : vector<8x256xf32>
    %106 = vector.extract_strided_slice %105 {offsets = [0, 64], sizes = [8, 64], strides = [1, 1]} : vector<8x256xf32> to vector<8x64xf32>
    %107 = arith.mulf %106, %90 : vector<8x64xf32>
    %108 = vector.extract_strided_slice %105 {offsets = [0, 0], sizes = [8, 64], strides = [1, 1]} : vector<8x256xf32> to vector<8x64xf32>
    %109 = vector.extract_strided_slice %101 {offsets = [0, 128], sizes = [8, 64], strides = [1, 1]} : vector<8x256xf32> to vector<8x64xf32>
    %110 = arith.mulf %108, %109 : vector<8x64xf32>
    %111 = arith.addf %107, %110 : vector<8x64xf32>
    %112 = vector.extract_strided_slice %105 {offsets = [0, 192], sizes = [8, 64], strides = [1, 1]} : vector<8x256xf32> to vector<8x64xf32>
    %113 = math.tanh %111 : vector<8x64xf32>
    %114 = arith.mulf %112, %113 : vector<8x64xf32>
    %115 = vector.extract_strided_slice %114 {offsets = [0, 0], sizes = [8, 32], strides = [1, 1]} : vector<8x64xf32> to vector<8x32xf32>
    %c8_44 = arith.constant 8 : index
    %c0_45 = arith.constant 0 : index
    %116 = vector.load %arg19[%c8_44, %c0_45] : memref<64x64xf32, #tpu.memory_space<vmem>>, vector<8x32xf32>
    tpu.vector_store %arg19[%c8_44, %c0_45], %115 {strides = array<i32>} : memref<64x64xf32, #tpu.memory_space<vmem>>, vector<8x32xf32>,
    %117 = vector.extract_strided_slice %114 {offsets = [0, 32], sizes = [8, 32], strides = [1, 1]} : vector<8x64xf32> to vector<8x32xf32>
    %c48_46 = arith.constant 48 : index
    %c32_47 = arith.constant 32 : index
    %118 = vector.load %arg19[%c48_46, %c32_47] : memref<64x64xf32, #tpu.memory_space<vmem>>, vector<8x32xf32>
    tpu.vector_store %arg19[%c48_46, %c32_47], %117 {strides = array<i32>} : memref<64x64xf32, #tpu.memory_space<vmem>>, vector<8x32xf32>,
    %c16_48 = arith.constant 16 : index
    %c0_49 = arith.constant 0 : index
    %119 = vector.load %arg18[%c16_48, %c0_49] : memref<64x256xf32, #tpu.memory_space<vmem>>, vector<8x256xf32>
    %cst_50 = arith.constant dense<0.000000e+00> : vector<8x256xf32>
    %120 = tpu.matmul %114, %76, %cst_50 {dimension_numbers = #tpu.dot_dimension_numbers<[1], [0], [0], [1], [0, 0, 1, 1], [], []>} : vector<8x64xf32>, vector<64x256xf32>, vector<8x256xf32> -> vector<8x256xf32>
    %121 = arith.addf %119, %120 : vector<8x256xf32>
    %122 = math.tanh %121 : vector<8x256xf32>
    %cst_51 = arith.constant 5.000000e-01 : f32
    %123 = vector.broadcast %cst_51 : f32 to vector<8x256xf32>
    %124 = arith.mulf %123, %122 : vector<8x256xf32>
    %cst_52 = arith.constant 5.000000e-01 : f32
    %125 = vector.broadcast %cst_52 : f32 to vector<8x256xf32>
    %126 = arith.addf %124, %125 : vector<8x256xf32>
    %127 = vector.extract_strided_slice %126 {offsets = [0, 64], sizes = [8, 64], strides = [1, 1]} : vector<8x256xf32> to vector<8x64xf32>
    %128 = arith.mulf %127, %111 : vector<8x64xf32>
    %129 = vector.extract_strided_slice %126 {offsets = [0, 0], sizes = [8, 64], strides = [1, 1]} : vector<8x256xf32> to vector<8x64xf32>
    %130 = vector.extract_strided_slice %122 {offsets = [0, 128], sizes = [8, 64], strides = [1, 1]} : vector<8x256xf32> to vector<8x64xf32>
    %131 = arith.mulf %129, %130 : vector<8x64xf32>
    %132 = arith.addf %128, %131 : vector<8x64xf32>
    %133 = vector.extract_strided_slice %126 {offsets = [0, 192], sizes = [8, 64], strides = [1, 1]} : vector<8x256xf32> to vector<8x64xf32>
    %134 = math.tanh %132 : vector<8x64xf32>
    %135 = arith.mulf %133, %134 : vector<8x64xf32>
    %136 = vector.extract_strided_slice %135 {offsets = [0, 0], sizes = [8, 32], strides = [1, 1]} : vector<8x64xf32> to vector<8x32xf32>
    %c16_53 = arith.constant 16 : index
    %c0_54 = arith.constant 0 : index
    %137 = vector.load %arg19[%c16_53, %c0_54] : memref<64x64xf32, #tpu.memory_space<vmem>>, vector<8x32xf32>
    tpu.vector_store %arg19[%c16_53, %c0_54], %136 {strides = array<i32>} : memref<64x64xf32, #tpu.memory_space<vmem>>, vector<8x32xf32>,
    %138 = vector.extract_strided_slice %135 {offsets = [0, 32], sizes = [8, 32], strides = [1, 1]} : vector<8x64xf32> to vector<8x32xf32>
    %c40_55 = arith.constant 40 : index
    %c32_56 = arith.constant 32 : index
    %139 = vector.load %arg19[%c40_55, %c32_56] : memref<64x64xf32, #tpu.memory_space<vmem>>, vector<8x32xf32>
    tpu.vector_store %arg19[%c40_55, %c32_56], %138 {strides = array<i32>} : memref<64x64xf32, #tpu.memory_space<vmem>>, vector<8x32xf32>,
    %c24_57 = arith.constant 24 : index
    %c0_58 = arith.constant 0 : index
    %140 = vector.load %arg18[%c24_57, %c0_58] : memref<64x256xf32, #tpu.memory_space<vmem>>, vector<8x256xf32>
    %cst_59 = arith.constant dense<0.000000e+00> : vector<8x256xf32>
    %141 = tpu.matmul %135, %76, %cst_59 {dimension_numbers = #tpu.dot_dimension_numbers<[1], [0], [0], [1], [0, 0, 1, 1], [], []>} : vector<8x64xf32>, vector<64x256xf32>, vector<8x256xf32> -> vector<8x256xf32>
    %142 = arith.addf %140, %141 : vector<8x256xf32>
    %143 = math.tanh %142 : vector<8x256xf32>
    %cst_60 = arith.constant 5.000000e-01 : f32
    %144 = vector.broadcast %cst_60 : f32 to vector<8x256xf32>
    %145 = arith.mulf %144, %143 : vector<8x256xf32>
    %cst_61 = arith.constant 5.000000e-01 : f32
    %146 = vector.broadcast %cst_61 : f32 to vector<8x256xf32>
    %147 = arith.addf %145, %146 : vector<8x256xf32>
    %148 = vector.extract_strided_slice %147 {offsets = [0, 64], sizes = [8, 64], strides = [1, 1]} : vector<8x256xf32> to vector<8x64xf32>
    %149 = arith.mulf %148, %132 : vector<8x64xf32>
    %150 = vector.extract_strided_slice %147 {offsets = [0, 0], sizes = [8, 64], strides = [1, 1]} : vector<8x256xf32> to vector<8x64xf32>
    %151 = vector.extract_strided_slice %143 {offsets = [0, 128], sizes = [8, 64], strides = [1, 1]} : vector<8x256xf32> to vector<8x64xf32>
    %152 = arith.mulf %150, %151 : vector<8x64xf32>
    %153 = arith.addf %149, %152 : vector<8x64xf32>
    %154 = vector.extract_strided_slice %147 {offsets = [0, 192], sizes = [8, 64], strides = [1, 1]} : vector<8x256xf32> to vector<8x64xf32>
    %155 = math.tanh %153 : vector<8x64xf32>
    %156 = arith.mulf %154, %155 : vector<8x64xf32>
    %157 = vector.extract_strided_slice %156 {offsets = [0, 0], sizes = [8, 32], strides = [1, 1]} : vector<8x64xf32> to vector<8x32xf32>
    %c24_62 = arith.constant 24 : index
    %c0_63 = arith.constant 0 : index
    %158 = vector.load %arg19[%c24_62, %c0_63] : memref<64x64xf32, #tpu.memory_space<vmem>>, vector<8x32xf32>
    tpu.vector_store %arg19[%c24_62, %c0_63], %157 {strides = array<i32>} : memref<64x64xf32, #tpu.memory_space<vmem>>, vector<8x32xf32>,
    %159 = vector.extract_strided_slice %156 {offsets = [0, 32], sizes = [8, 32], strides = [1, 1]} : vector<8x64xf32> to vector<8x32xf32>
    %c32_64 = arith.constant 32 : index
    %c32_65 = arith.constant 32 : index
    %160 = vector.load %arg19[%c32_64, %c32_65] : memref<64x64xf32, #tpu.memory_space<vmem>>, vector<8x32xf32>
    tpu.vector_store %arg19[%c32_64, %c32_65], %159 {strides = array<i32>} : memref<64x64xf32, #tpu.memory_space<vmem>>, vector<8x32xf32>,
    %c32_66 = arith.constant 32 : index
    %c0_67 = arith.constant 0 : index
    %161 = vector.load %arg18[%c32_66, %c0_67] : memref<64x256xf32, #tpu.memory_space<vmem>>, vector<8x256xf32>
    %cst_68 = arith.constant dense<0.000000e+00> : vector<8x256xf32>
    %162 = tpu.matmul %156, %76, %cst_68 {dimension_numbers = #tpu.dot_dimension_numbers<[1], [0], [0], [1], [0, 0, 1, 1], [], []>} : vector<8x64xf32>, vector<64x256xf32>, vector<8x256xf32> -> vector<8x256xf32>
    %163 = arith.addf %161, %162 : vector<8x256xf32>
    %164 = math.tanh %163 : vector<8x256xf32>
    %cst_69 = arith.constant 5.000000e-01 : f32
    %165 = vector.broadcast %cst_69 : f32 to vector<8x256xf32>
    %166 = arith.mulf %165, %164 : vector<8x256xf32>
    %cst_70 = arith.constant 5.000000e-01 : f32
    %167 = vector.broadcast %cst_70 : f32 to vector<8x256xf32>
    %168 = arith.addf %166, %167 : vector<8x256xf32>
    %169 = vector.extract_strided_slice %168 {offsets = [0, 64], sizes = [8, 64], strides = [1, 1]} : vector<8x256xf32> to vector<8x64xf32>
    %170 = arith.mulf %169, %153 : vector<8x64xf32>
    %171 = vector.extract_strided_slice %168 {offsets = [0, 0], sizes = [8, 64], strides = [1, 1]} : vector<8x256xf32> to vector<8x64xf32>
    %172 = vector.extract_strided_slice %164 {offsets = [0, 128], sizes = [8, 64], strides = [1, 1]} : vector<8x256xf32> to vector<8x64xf32>
    %173 = arith.mulf %171, %172 : vector<8x64xf32>
    %174 = arith.addf %170, %173 : vector<8x64xf32>
    %175 = vector.extract_strided_slice %168 {offsets = [0, 192], sizes = [8, 64], strides = [1, 1]} : vector<8x256xf32> to vector<8x64xf32>
    %176 = math.tanh %174 : vector<8x64xf32>
    %177 = arith.mulf %175, %176 : vector<8x64xf32>
    %178 = vector.extract_strided_slice %177 {offsets = [0, 0], sizes = [8, 32], strides = [1, 1]} : vector<8x64xf32> to vector<8x32xf32>
    %c32_71 = arith.constant 32 : index
    %c0_72 = arith.constant 0 : index
    %179 = vector.load %arg19[%c32_71, %c0_72] : memref<64x64xf32, #tpu.memory_space<vmem>>, vector<8x32xf32>
    tpu.vector_store %arg19[%c32_71, %c0_72], %178 {strides = array<i32>} : memref<64x64xf32, #tpu.memory_space<vmem>>, vector<8x32xf32>,
    %180 = vector.extract_strided_slice %177 {offsets = [0, 32], sizes = [8, 32], strides = [1, 1]} : vector<8x64xf32> to vector<8x32xf32>
    %c24_73 = arith.constant 24 : index
    %c32_74 = arith.constant 32 : index
    %181 = vector.load %arg19[%c24_73, %c32_74] : memref<64x64xf32, #tpu.memory_space<vmem>>, vector<8x32xf32>
    tpu.vector_store %arg19[%c24_73, %c32_74], %180 {strides = array<i32>} : memref<64x64xf32, #tpu.memory_space<vmem>>, vector<8x32xf32>,
    %c40_75 = arith.constant 40 : index
    %c0_76 = arith.constant 0 : index
    %182 = vector.load %arg18[%c40_75, %c0_76] : memref<64x256xf32, #tpu.memory_space<vmem>>, vector<8x256xf32>
    %cst_77 = arith.constant dense<0.000000e+00> : vector<8x256xf32>
    %183 = tpu.matmul %177, %76, %cst_77 {dimension_numbers = #tpu.dot_dimension_numbers<[1], [0], [0], [1], [0, 0, 1, 1], [], []>} : vector<8x64xf32>, vector<64x256xf32>, vector<8x256xf32> -> vector<8x256xf32>
    %184 = arith.addf %182, %183 : vector<8x256xf32>
    %185 = math.tanh %184 : vector<8x256xf32>
    %cst_78 = arith.constant 5.000000e-01 : f32
    %186 = vector.broadcast %cst_78 : f32 to vector<8x256xf32>
    %187 = arith.mulf %186, %185 : vector<8x256xf32>
    %cst_79 = arith.constant 5.000000e-01 : f32
    %188 = vector.broadcast %cst_79 : f32 to vector<8x256xf32>
    %189 = arith.addf %187, %188 : vector<8x256xf32>
    %190 = vector.extract_strided_slice %189 {offsets = [0, 64], sizes = [8, 64], strides = [1, 1]} : vector<8x256xf32> to vector<8x64xf32>
    %191 = arith.mulf %190, %174 : vector<8x64xf32>
    %192 = vector.extract_strided_slice %189 {offsets = [0, 0], sizes = [8, 64], strides = [1, 1]} : vector<8x256xf32> to vector<8x64xf32>
    %193 = vector.extract_strided_slice %185 {offsets = [0, 128], sizes = [8, 64], strides = [1, 1]} : vector<8x256xf32> to vector<8x64xf32>
    %194 = arith.mulf %192, %193 : vector<8x64xf32>
    %195 = arith.addf %191, %194 : vector<8x64xf32>
    %196 = vector.extract_strided_slice %189 {offsets = [0, 192], sizes = [8, 64], strides = [1, 1]} : vector<8x256xf32> to vector<8x64xf32>
    %197 = math.tanh %195 : vector<8x64xf32>
    %198 = arith.mulf %196, %197 : vector<8x64xf32>
    %199 = vector.extract_strided_slice %198 {offsets = [0, 0], sizes = [8, 32], strides = [1, 1]} : vector<8x64xf32> to vector<8x32xf32>
    %c40_80 = arith.constant 40 : index
    %c0_81 = arith.constant 0 : index
    %200 = vector.load %arg19[%c40_80, %c0_81] : memref<64x64xf32, #tpu.memory_space<vmem>>, vector<8x32xf32>
    tpu.vector_store %arg19[%c40_80, %c0_81], %199 {strides = array<i32>} : memref<64x64xf32, #tpu.memory_space<vmem>>, vector<8x32xf32>,
    %201 = vector.extract_strided_slice %198 {offsets = [0, 32], sizes = [8, 32], strides = [1, 1]} : vector<8x64xf32> to vector<8x32xf32>
    %c16_82 = arith.constant 16 : index
    %c32_83 = arith.constant 32 : index
    %202 = vector.load %arg19[%c16_82, %c32_83] : memref<64x64xf32, #tpu.memory_space<vmem>>, vector<8x32xf32>
    tpu.vector_store %arg19[%c16_82, %c32_83], %201 {strides = array<i32>} : memref<64x64xf32, #tpu.memory_space<vmem>>, vector<8x32xf32>,
    %c48_84 = arith.constant 48 : index
    %c0_85 = arith.constant 0 : index
    %203 = vector.load %arg18[%c48_84, %c0_85] : memref<64x256xf32, #tpu.memory_space<vmem>>, vector<8x256xf32>
    %cst_86 = arith.constant dense<0.000000e+00> : vector<8x256xf32>
    %204 = tpu.matmul %198, %76, %cst_86 {dimension_numbers = #tpu.dot_dimension_numbers<[1], [0], [0], [1], [0, 0, 1, 1], [], []>} : vector<8x64xf32>, vector<64x256xf32>, vector<8x256xf32> -> vector<8x256xf32>
    %205 = arith.addf %203, %204 : vector<8x256xf32>
    %206 = math.tanh %205 : vector<8x256xf32>
    %cst_87 = arith.constant 5.000000e-01 : f32
    %207 = vector.broadcast %cst_87 : f32 to vector<8x256xf32>
    %208 = arith.mulf %207, %206 : vector<8x256xf32>
    %cst_88 = arith.constant 5.000000e-01 : f32
    %209 = vector.broadcast %cst_88 : f32 to vector<8x256xf32>
    %210 = arith.addf %208, %209 : vector<8x256xf32>
    %211 = vector.extract_strided_slice %210 {offsets = [0, 64], sizes = [8, 64], strides = [1, 1]} : vector<8x256xf32> to vector<8x64xf32>
    %212 = arith.mulf %211, %195 : vector<8x64xf32>
    %213 = vector.extract_strided_slice %210 {offsets = [0, 0], sizes = [8, 64], strides = [1, 1]} : vector<8x256xf32> to vector<8x64xf32>
    %214 = vector.extract_strided_slice %206 {offsets = [0, 128], sizes = [8, 64], strides = [1, 1]} : vector<8x256xf32> to vector<8x64xf32>
    %215 = arith.mulf %213, %214 : vector<8x64xf32>
    %216 = arith.addf %212, %215 : vector<8x64xf32>
    %217 = vector.extract_strided_slice %210 {offsets = [0, 192], sizes = [8, 64], strides = [1, 1]} : vector<8x256xf32> to vector<8x64xf32>
    %218 = math.tanh %216 : vector<8x64xf32>
    %219 = arith.mulf %217, %218 : vector<8x64xf32>
    %220 = vector.extract_strided_slice %219 {offsets = [0, 0], sizes = [8, 32], strides = [1, 1]} : vector<8x64xf32> to vector<8x32xf32>
    %c48_89 = arith.constant 48 : index
    %c0_90 = arith.constant 0 : index
    %221 = vector.load %arg19[%c48_89, %c0_90] : memref<64x64xf32, #tpu.memory_space<vmem>>, vector<8x32xf32>
    tpu.vector_store %arg19[%c48_89, %c0_90], %220 {strides = array<i32>} : memref<64x64xf32, #tpu.memory_space<vmem>>, vector<8x32xf32>,
    %222 = vector.extract_strided_slice %219 {offsets = [0, 32], sizes = [8, 32], strides = [1, 1]} : vector<8x64xf32> to vector<8x32xf32>
    %c8_91 = arith.constant 8 : index
    %c32_92 = arith.constant 32 : index
    %223 = vector.load %arg19[%c8_91, %c32_92] : memref<64x64xf32, #tpu.memory_space<vmem>>, vector<8x32xf32>
    tpu.vector_store %arg19[%c8_91, %c32_92], %222 {strides = array<i32>} : memref<64x64xf32, #tpu.memory_space<vmem>>, vector<8x32xf32>,
    %c56_93 = arith.constant 56 : index
    %c0_94 = arith.constant 0 : index
    %224 = vector.load %arg18[%c56_93, %c0_94] : memref<64x256xf32, #tpu.memory_space<vmem>>, vector<8x256xf32>
    %cst_95 = arith.constant dense<0.000000e+00> : vector<8x256xf32>
    %225 = tpu.matmul %219, %76, %cst_95 {dimension_numbers = #tpu.dot_dimension_numbers<[1], [0], [0], [1], [0, 0, 1, 1], [], []>} : vector<8x64xf32>, vector<64x256xf32>, vector<8x256xf32> -> vector<8x256xf32>
    %226 = arith.addf %224, %225 : vector<8x256xf32>
    %227 = math.tanh %226 : vector<8x256xf32>
    %cst_96 = arith.constant 5.000000e-01 : f32
    %228 = vector.broadcast %cst_96 : f32 to vector<8x256xf32>
    %229 = arith.mulf %228, %227 : vector<8x256xf32>
    %cst_97 = arith.constant 5.000000e-01 : f32
    %230 = vector.broadcast %cst_97 : f32 to vector<8x256xf32>
    %231 = arith.addf %229, %230 : vector<8x256xf32>
    %232 = vector.extract_strided_slice %231 {offsets = [0, 64], sizes = [8, 64], strides = [1, 1]} : vector<8x256xf32> to vector<8x64xf32>
    %233 = arith.mulf %232, %216 : vector<8x64xf32>
    %234 = vector.extract_strided_slice %231 {offsets = [0, 0], sizes = [8, 64], strides = [1, 1]} : vector<8x256xf32> to vector<8x64xf32>
    %235 = vector.extract_strided_slice %227 {offsets = [0, 128], sizes = [8, 64], strides = [1, 1]} : vector<8x256xf32> to vector<8x64xf32>
    %236 = arith.mulf %234, %235 : vector<8x64xf32>
    %237 = arith.addf %233, %236 : vector<8x64xf32>
    %238 = vector.extract_strided_slice %231 {offsets = [0, 192], sizes = [8, 64], strides = [1, 1]} : vector<8x256xf32> to vector<8x64xf32>
    %239 = math.tanh %237 : vector<8x64xf32>
    %240 = arith.mulf %238, %239 : vector<8x64xf32>
    %241 = vector.extract_strided_slice %240 {offsets = [0, 0], sizes = [8, 32], strides = [1, 1]} : vector<8x64xf32> to vector<8x32xf32>
    %c56_98 = arith.constant 56 : index
    %c0_99 = arith.constant 0 : index
    %242 = vector.load %arg19[%c56_98, %c0_99] : memref<64x64xf32, #tpu.memory_space<vmem>>, vector<8x32xf32>
    tpu.vector_store %arg19[%c56_98, %c0_99], %241 {strides = array<i32>} : memref<64x64xf32, #tpu.memory_space<vmem>>, vector<8x32xf32>,
    %243 = vector.extract_strided_slice %240 {offsets = [0, 32], sizes = [8, 32], strides = [1, 1]} : vector<8x64xf32> to vector<8x32xf32>
    %c0_100 = arith.constant 0 : index
    %c32_101 = arith.constant 32 : index
    %244 = vector.load %arg19[%c0_100, %c32_101] : memref<64x64xf32, #tpu.memory_space<vmem>>, vector<8x32xf32>
    tpu.vector_store %arg19[%c0_100, %c32_101], %243 {strides = array<i32>} : memref<64x64xf32, #tpu.memory_space<vmem>>, vector<8x32xf32>,
    %c0_102 = arith.constant 0 : index
    %c0_103 = arith.constant 0 : index
    %245 = vector.load %arg19[%c0_102, %c0_103] : memref<64x64xf32, #tpu.memory_space<vmem>>, vector<64x64xf32>
    %c0_104 = arith.constant 0 : index
    %c0_105 = arith.constant 0 : index
    %246 = vector.load %arg7[%c0_104, %c0_105] : memref<64x256xf32, #tpu.memory_space<vmem>>, vector<64x256xf32>
    %cst_106 = arith.constant dense<0.000000e+00> : vector<64x256xf32>
    %247 = tpu.matmul %245, %246, %cst_106 {dimension_numbers = #tpu.dot_dimension_numbers<[1], [0], [0], [1], [0, 0, 1, 1], [], []>} : vector<64x64xf32>, vector<64x256xf32>, vector<64x256xf32> -> vector<64x256xf32>
    %c0_107 = arith.constant 0 : index
    %c0_108 = arith.constant 0 : index
    %248 = vector.load %arg8[%c0_107, %c0_108] : memref<64x256xf32, #tpu.memory_space<vmem>>, vector<64x256xf32>
    %cst_109 = arith.constant dense<0.000000e+00> : vector<64x256xf32>
    %249 = tpu.matmul %245, %248, %cst_109 {dimension_numbers = #tpu.dot_dimension_numbers<[1], [0], [0], [1], [0, 0, 1, 1], [], []>} : vector<64x64xf32>, vector<64x256xf32>, vector<64x256xf32> -> vector<64x256xf32>
    %c0_110 = arith.constant 0 : index
    %c0_111 = arith.constant 0 : index
    %250 = vector.load %arg10[%c0_110, %c0_111] : memref<1x256xf32, #tpu.memory_space<vmem>>, vector<1x256xf32>
    %251 = vector.extract_strided_slice %247 {offsets = [0, 0], sizes = [8, 256], strides = [1, 1]} : vector<64x256xf32> to vector<8x256xf32>
    %252 = vector.extract_strided_slice %249 {offsets = [56, 0], sizes = [8, 256], strides = [1, 1]} : vector<64x256xf32> to vector<8x256xf32>
    %253 = arith.addf %251, %252 : vector<8x256xf32>
    %254 = vector.broadcast %250 : vector<1x256xf32> to vector<8x256xf32>
    %255 = arith.addf %253, %254 : vector<8x256xf32>
    %c0_112 = arith.constant 0 : index
    %c0_113 = arith.constant 0 : index
    %256 = vector.load %arg18[%c0_112, %c0_113] : memref<64x256xf32, #tpu.memory_space<vmem>>, vector<8x256xf32>
    tpu.vector_store %arg18[%c0_112, %c0_113], %255 {strides = array<i32>} : memref<64x256xf32, #tpu.memory_space<vmem>>, vector<8x256xf32>,
    %257 = vector.extract_strided_slice %247 {offsets = [8, 0], sizes = [8, 256], strides = [1, 1]} : vector<64x256xf32> to vector<8x256xf32>
    %258 = vector.extract_strided_slice %249 {offsets = [48, 0], sizes = [8, 256], strides = [1, 1]} : vector<64x256xf32> to vector<8x256xf32>
    %259 = arith.addf %257, %258 : vector<8x256xf32>
    %260 = vector.broadcast %250 : vector<1x256xf32> to vector<8x256xf32>
    %261 = arith.addf %259, %260 : vector<8x256xf32>
    %c8_114 = arith.constant 8 : index
    %c0_115 = arith.constant 0 : index
    %262 = vector.load %arg18[%c8_114, %c0_115] : memref<64x256xf32, #tpu.memory_space<vmem>>, vector<8x256xf32>
    tpu.vector_store %arg18[%c8_114, %c0_115], %261 {strides = array<i32>} : memref<64x256xf32, #tpu.memory_space<vmem>>, vector<8x256xf32>,
    %263 = vector.extract_strided_slice %247 {offsets = [16, 0], sizes = [8, 256], strides = [1, 1]} : vector<64x256xf32> to vector<8x256xf32>
    %264 = vector.extract_strided_slice %249 {offsets = [40, 0], sizes = [8, 256], strides = [1, 1]} : vector<64x256xf32> to vector<8x256xf32>
    %265 = arith.addf %263, %264 : vector<8x256xf32>
    %266 = vector.broadcast %250 : vector<1x256xf32> to vector<8x256xf32>
    %267 = arith.addf %265, %266 : vector<8x256xf32>
    %c16_116 = arith.constant 16 : index
    %c0_117 = arith.constant 0 : index
    %268 = vector.load %arg18[%c16_116, %c0_117] : memref<64x256xf32, #tpu.memory_space<vmem>>, vector<8x256xf32>
    tpu.vector_store %arg18[%c16_116, %c0_117], %267 {strides = array<i32>} : memref<64x256xf32, #tpu.memory_space<vmem>>, vector<8x256xf32>,
    %269 = vector.extract_strided_slice %247 {offsets = [24, 0], sizes = [8, 256], strides = [1, 1]} : vector<64x256xf32> to vector<8x256xf32>
    %270 = vector.extract_strided_slice %249 {offsets = [32, 0], sizes = [8, 256], strides = [1, 1]} : vector<64x256xf32> to vector<8x256xf32>
    %271 = arith.addf %269, %270 : vector<8x256xf32>
    %272 = vector.broadcast %250 : vector<1x256xf32> to vector<8x256xf32>
    %273 = arith.addf %271, %272 : vector<8x256xf32>
    %c24_118 = arith.constant 24 : index
    %c0_119 = arith.constant 0 : index
    %274 = vector.load %arg18[%c24_118, %c0_119] : memref<64x256xf32, #tpu.memory_space<vmem>>, vector<8x256xf32>
    tpu.vector_store %arg18[%c24_118, %c0_119], %273 {strides = array<i32>} : memref<64x256xf32, #tpu.memory_space<vmem>>, vector<8x256xf32>,
    %275 = vector.extract_strided_slice %247 {offsets = [32, 0], sizes = [8, 256], strides = [1, 1]} : vector<64x256xf32> to vector<8x256xf32>
    %276 = vector.extract_strided_slice %249 {offsets = [24, 0], sizes = [8, 256], strides = [1, 1]} : vector<64x256xf32> to vector<8x256xf32>
    %277 = arith.addf %275, %276 : vector<8x256xf32>
    %278 = vector.broadcast %250 : vector<1x256xf32> to vector<8x256xf32>
    %279 = arith.addf %277, %278 : vector<8x256xf32>
    %c32_120 = arith.constant 32 : index
    %c0_121 = arith.constant 0 : index
    %280 = vector.load %arg18[%c32_120, %c0_121] : memref<64x256xf32, #tpu.memory_space<vmem>>, vector<8x256xf32>
    tpu.vector_store %arg18[%c32_120, %c0_121], %279 {strides = array<i32>} : memref<64x256xf32, #tpu.memory_space<vmem>>, vector<8x256xf32>,
    %281 = vector.extract_strided_slice %247 {offsets = [40, 0], sizes = [8, 256], strides = [1, 1]} : vector<64x256xf32> to vector<8x256xf32>
    %282 = vector.extract_strided_slice %249 {offsets = [16, 0], sizes = [8, 256], strides = [1, 1]} : vector<64x256xf32> to vector<8x256xf32>
    %283 = arith.addf %281, %282 : vector<8x256xf32>
    %284 = vector.broadcast %250 : vector<1x256xf32> to vector<8x256xf32>
    %285 = arith.addf %283, %284 : vector<8x256xf32>
    %c40_122 = arith.constant 40 : index
    %c0_123 = arith.constant 0 : index
    %286 = vector.load %arg18[%c40_122, %c0_123] : memref<64x256xf32, #tpu.memory_space<vmem>>, vector<8x256xf32>
    tpu.vector_store %arg18[%c40_122, %c0_123], %285 {strides = array<i32>} : memref<64x256xf32, #tpu.memory_space<vmem>>, vector<8x256xf32>,
    %287 = vector.extract_strided_slice %247 {offsets = [48, 0], sizes = [8, 256], strides = [1, 1]} : vector<64x256xf32> to vector<8x256xf32>
    %288 = vector.extract_strided_slice %249 {offsets = [8, 0], sizes = [8, 256], strides = [1, 1]} : vector<64x256xf32> to vector<8x256xf32>
    %289 = arith.addf %287, %288 : vector<8x256xf32>
    %290 = vector.broadcast %250 : vector<1x256xf32> to vector<8x256xf32>
    %291 = arith.addf %289, %290 : vector<8x256xf32>
    %c48_124 = arith.constant 48 : index
    %c0_125 = arith.constant 0 : index
    %292 = vector.load %arg18[%c48_124, %c0_125] : memref<64x256xf32, #tpu.memory_space<vmem>>, vector<8x256xf32>
    tpu.vector_store %arg18[%c48_124, %c0_125], %291 {strides = array<i32>} : memref<64x256xf32, #tpu.memory_space<vmem>>, vector<8x256xf32>,
    %293 = vector.extract_strided_slice %247 {offsets = [56, 0], sizes = [8, 256], strides = [1, 1]} : vector<64x256xf32> to vector<8x256xf32>
    %294 = vector.extract_strided_slice %249 {offsets = [0, 0], sizes = [8, 256], strides = [1, 1]} : vector<64x256xf32> to vector<8x256xf32>
    %295 = arith.addf %293, %294 : vector<8x256xf32>
    %296 = vector.broadcast %250 : vector<1x256xf32> to vector<8x256xf32>
    %297 = arith.addf %295, %296 : vector<8x256xf32>
    %c56_126 = arith.constant 56 : index
    %c0_127 = arith.constant 0 : index
    %298 = vector.load %arg18[%c56_126, %c0_127] : memref<64x256xf32, #tpu.memory_space<vmem>>, vector<8x256xf32>
    tpu.vector_store %arg18[%c56_126, %c0_127], %297 {strides = array<i32>} : memref<64x256xf32, #tpu.memory_space<vmem>>, vector<8x256xf32>,
    %c1 = arith.constant 1 : index
    %c0_128 = arith.constant 0 : index
    %c0_129 = arith.constant 0 : index
    %299 = vector.load %arg1[%c1, %c0_128, %c0_129] : memref<2x8x64xf32, #tpu.memory_space<vmem>>, vector<1x8x64xf32>
    %300 = vector.shape_cast %299 : vector<1x8x64xf32> to vector<8x64xf32>
    %c1_130 = arith.constant 1 : index
    %c0_131 = arith.constant 0 : index
    %c0_132 = arith.constant 0 : index
    %301 = vector.load %arg2[%c1_130, %c0_131, %c0_132] : memref<2x8x64xf32, #tpu.memory_space<vmem>>, vector<1x8x64xf32>
    %302 = vector.shape_cast %301 : vector<1x8x64xf32> to vector<8x64xf32>
    %c0_133 = arith.constant 0 : index
    %c0_134 = arith.constant 0 : index
    %303 = vector.load %arg9[%c0_133, %c0_134] : memref<64x256xf32, #tpu.memory_space<vmem>>, vector<64x256xf32>
    %c0_135 = arith.constant 0 : index
    %c0_136 = arith.constant 0 : index
    %304 = vector.load %arg18[%c0_135, %c0_136] : memref<64x256xf32, #tpu.memory_space<vmem>>, vector<8x256xf32>
    %cst_137 = arith.constant dense<0.000000e+00> : vector<8x256xf32>
    %305 = tpu.matmul %300, %303, %cst_137 {dimension_numbers = #tpu.dot_dimension_numbers<[1], [0], [0], [1], [0, 0, 1, 1], [], []>} : vector<8x64xf32>, vector<64x256xf32>, vector<8x256xf32> -> vector<8x256xf32>
    %306 = arith.addf %304, %305 : vector<8x256xf32>
    %307 = math.tanh %306 : vector<8x256xf32>
    %cst_138 = arith.constant 5.000000e-01 : f32
    %308 = vector.broadcast %cst_138 : f32 to vector<8x256xf32>
    %309 = arith.mulf %308, %307 : vector<8x256xf32>
    %cst_139 = arith.constant 5.000000e-01 : f32
    %310 = vector.broadcast %cst_139 : f32 to vector<8x256xf32>
    %311 = arith.addf %309, %310 : vector<8x256xf32>
    %312 = vector.extract_strided_slice %311 {offsets = [0, 64], sizes = [8, 64], strides = [1, 1]} : vector<8x256xf32> to vector<8x64xf32>
    %313 = arith.mulf %312, %302 : vector<8x64xf32>
    %314 = vector.extract_strided_slice %311 {offsets = [0, 0], sizes = [8, 64], strides = [1, 1]} : vector<8x256xf32> to vector<8x64xf32>
    %315 = vector.extract_strided_slice %307 {offsets = [0, 128], sizes = [8, 64], strides = [1, 1]} : vector<8x256xf32> to vector<8x64xf32>
    %316 = arith.mulf %314, %315 : vector<8x64xf32>
    %317 = arith.addf %313, %316 : vector<8x64xf32>
    %318 = vector.extract_strided_slice %311 {offsets = [0, 192], sizes = [8, 64], strides = [1, 1]} : vector<8x256xf32> to vector<8x64xf32>
    %319 = math.tanh %317 : vector<8x64xf32>
    %320 = arith.mulf %318, %319 : vector<8x64xf32>
    %c8_140 = arith.constant 8 : index
    %c0_141 = arith.constant 0 : index
    %321 = vector.load %arg18[%c8_140, %c0_141] : memref<64x256xf32, #tpu.memory_space<vmem>>, vector<8x256xf32>
    %cst_142 = arith.constant dense<0.000000e+00> : vector<8x256xf32>
    %322 = tpu.matmul %320, %303, %cst_142 {dimension_numbers = #tpu.dot_dimension_numbers<[1], [0], [0], [1], [0, 0, 1, 1], [], []>} : vector<8x64xf32>, vector<64x256xf32>, vector<8x256xf32> -> vector<8x256xf32>
    %323 = arith.addf %321, %322 : vector<8x256xf32>
    %324 = math.tanh %323 : vector<8x256xf32>
    %cst_143 = arith.constant 5.000000e-01 : f32
    %325 = vector.broadcast %cst_143 : f32 to vector<8x256xf32>
    %326 = arith.mulf %325, %324 : vector<8x256xf32>
    %cst_144 = arith.constant 5.000000e-01 : f32
    %327 = vector.broadcast %cst_144 : f32 to vector<8x256xf32>
    %328 = arith.addf %326, %327 : vector<8x256xf32>
    %329 = vector.extract_strided_slice %328 {offsets = [0, 64], sizes = [8, 64], strides = [1, 1]} : vector<8x256xf32> to vector<8x64xf32>
    %330 = arith.mulf %329, %317 : vector<8x64xf32>
    %331 = vector.extract_strided_slice %328 {offsets = [0, 0], sizes = [8, 64], strides = [1, 1]} : vector<8x256xf32> to vector<8x64xf32>
    %332 = vector.extract_strided_slice %324 {offsets = [0, 128], sizes = [8, 64], strides = [1, 1]} : vector<8x256xf32> to vector<8x64xf32>
    %333 = arith.mulf %331, %332 : vector<8x64xf32>
    %334 = arith.addf %330, %333 : vector<8x64xf32>
    %335 = vector.extract_strided_slice %328 {offsets = [0, 192], sizes = [8, 64], strides = [1, 1]} : vector<8x256xf32> to vector<8x64xf32>
    %336 = math.tanh %334 : vector<8x64xf32>
    %337 = arith.mulf %335, %336 : vector<8x64xf32>
    %c16_145 = arith.constant 16 : index
    %c0_146 = arith.constant 0 : index
    %338 = vector.load %arg18[%c16_145, %c0_146] : memref<64x256xf32, #tpu.memory_space<vmem>>, vector<8x256xf32>
    %cst_147 = arith.constant dense<0.000000e+00> : vector<8x256xf32>
    %339 = tpu.matmul %337, %303, %cst_147 {dimension_numbers = #tpu.dot_dimension_numbers<[1], [0], [0], [1], [0, 0, 1, 1], [], []>} : vector<8x64xf32>, vector<64x256xf32>, vector<8x256xf32> -> vector<8x256xf32>
    %340 = arith.addf %338, %339 : vector<8x256xf32>
    %341 = math.tanh %340 : vector<8x256xf32>
    %cst_148 = arith.constant 5.000000e-01 : f32
    %342 = vector.broadcast %cst_148 : f32 to vector<8x256xf32>
    %343 = arith.mulf %342, %341 : vector<8x256xf32>
    %cst_149 = arith.constant 5.000000e-01 : f32
    %344 = vector.broadcast %cst_149 : f32 to vector<8x256xf32>
    %345 = arith.addf %343, %344 : vector<8x256xf32>
    %346 = vector.extract_strided_slice %345 {offsets = [0, 64], sizes = [8, 64], strides = [1, 1]} : vector<8x256xf32> to vector<8x64xf32>
    %347 = arith.mulf %346, %334 : vector<8x64xf32>
    %348 = vector.extract_strided_slice %345 {offsets = [0, 0], sizes = [8, 64], strides = [1, 1]} : vector<8x256xf32> to vector<8x64xf32>
    %349 = vector.extract_strided_slice %341 {offsets = [0, 128], sizes = [8, 64], strides = [1, 1]} : vector<8x256xf32> to vector<8x64xf32>
    %350 = arith.mulf %348, %349 : vector<8x64xf32>
    %351 = arith.addf %347, %350 : vector<8x64xf32>
    %352 = vector.extract_strided_slice %345 {offsets = [0, 192], sizes = [8, 64], strides = [1, 1]} : vector<8x256xf32> to vector<8x64xf32>
    %353 = math.tanh %351 : vector<8x64xf32>
    %354 = arith.mulf %352, %353 : vector<8x64xf32>
    %c24_150 = arith.constant 24 : index
    %c0_151 = arith.constant 0 : index
    %355 = vector.load %arg18[%c24_150, %c0_151] : memref<64x256xf32, #tpu.memory_space<vmem>>, vector<8x256xf32>
    %cst_152 = arith.constant dense<0.000000e+00> : vector<8x256xf32>
    %356 = tpu.matmul %354, %303, %cst_152 {dimension_numbers = #tpu.dot_dimension_numbers<[1], [0], [0], [1], [0, 0, 1, 1], [], []>} : vector<8x64xf32>, vector<64x256xf32>, vector<8x256xf32> -> vector<8x256xf32>
    %357 = arith.addf %355, %356 : vector<8x256xf32>
    %358 = math.tanh %357 : vector<8x256xf32>
    %cst_153 = arith.constant 5.000000e-01 : f32
    %359 = vector.broadcast %cst_153 : f32 to vector<8x256xf32>
    %360 = arith.mulf %359, %358 : vector<8x256xf32>
    %cst_154 = arith.constant 5.000000e-01 : f32
    %361 = vector.broadcast %cst_154 : f32 to vector<8x256xf32>
    %362 = arith.addf %360, %361 : vector<8x256xf32>
    %363 = vector.extract_strided_slice %362 {offsets = [0, 64], sizes = [8, 64], strides = [1, 1]} : vector<8x256xf32> to vector<8x64xf32>
    %364 = arith.mulf %363, %351 : vector<8x64xf32>
    %365 = vector.extract_strided_slice %362 {offsets = [0, 0], sizes = [8, 64], strides = [1, 1]} : vector<8x256xf32> to vector<8x64xf32>
    %366 = vector.extract_strided_slice %358 {offsets = [0, 128], sizes = [8, 64], strides = [1, 1]} : vector<8x256xf32> to vector<8x64xf32>
    %367 = arith.mulf %365, %366 : vector<8x64xf32>
    %368 = arith.addf %364, %367 : vector<8x64xf32>
    %369 = vector.extract_strided_slice %362 {offsets = [0, 192], sizes = [8, 64], strides = [1, 1]} : vector<8x256xf32> to vector<8x64xf32>
    %370 = math.tanh %368 : vector<8x64xf32>
    %371 = arith.mulf %369, %370 : vector<8x64xf32>
    %c32_155 = arith.constant 32 : index
    %c0_156 = arith.constant 0 : index
    %372 = vector.load %arg18[%c32_155, %c0_156] : memref<64x256xf32, #tpu.memory_space<vmem>>, vector<8x256xf32>
    %cst_157 = arith.constant dense<0.000000e+00> : vector<8x256xf32>
    %373 = tpu.matmul %371, %303, %cst_157 {dimension_numbers = #tpu.dot_dimension_numbers<[1], [0], [0], [1], [0, 0, 1, 1], [], []>} : vector<8x64xf32>, vector<64x256xf32>, vector<8x256xf32> -> vector<8x256xf32>
    %374 = arith.addf %372, %373 : vector<8x256xf32>
    %375 = math.tanh %374 : vector<8x256xf32>
    %cst_158 = arith.constant 5.000000e-01 : f32
    %376 = vector.broadcast %cst_158 : f32 to vector<8x256xf32>
    %377 = arith.mulf %376, %375 : vector<8x256xf32>
    %cst_159 = arith.constant 5.000000e-01 : f32
    %378 = vector.broadcast %cst_159 : f32 to vector<8x256xf32>
    %379 = arith.addf %377, %378 : vector<8x256xf32>
    %380 = vector.extract_strided_slice %379 {offsets = [0, 64], sizes = [8, 64], strides = [1, 1]} : vector<8x256xf32> to vector<8x64xf32>
    %381 = arith.mulf %380, %368 : vector<8x64xf32>
    %382 = vector.extract_strided_slice %379 {offsets = [0, 0], sizes = [8, 64], strides = [1, 1]} : vector<8x256xf32> to vector<8x64xf32>
    %383 = vector.extract_strided_slice %375 {offsets = [0, 128], sizes = [8, 64], strides = [1, 1]} : vector<8x256xf32> to vector<8x64xf32>
    %384 = arith.mulf %382, %383 : vector<8x64xf32>
    %385 = arith.addf %381, %384 : vector<8x64xf32>
    %386 = vector.extract_strided_slice %379 {offsets = [0, 192], sizes = [8, 64], strides = [1, 1]} : vector<8x256xf32> to vector<8x64xf32>
    %387 = math.tanh %385 : vector<8x64xf32>
    %388 = arith.mulf %386, %387 : vector<8x64xf32>
    %c40_160 = arith.constant 40 : index
    %c0_161 = arith.constant 0 : index
    %389 = vector.load %arg18[%c40_160, %c0_161] : memref<64x256xf32, #tpu.memory_space<vmem>>, vector<8x256xf32>
    %cst_162 = arith.constant dense<0.000000e+00> : vector<8x256xf32>
    %390 = tpu.matmul %388, %303, %cst_162 {dimension_numbers = #tpu.dot_dimension_numbers<[1], [0], [0], [1], [0, 0, 1, 1], [], []>} : vector<8x64xf32>, vector<64x256xf32>, vector<8x256xf32> -> vector<8x256xf32>
    %391 = arith.addf %389, %390 : vector<8x256xf32>
    %392 = math.tanh %391 : vector<8x256xf32>
    %cst_163 = arith.constant 5.000000e-01 : f32
    %393 = vector.broadcast %cst_163 : f32 to vector<8x256xf32>
    %394 = arith.mulf %393, %392 : vector<8x256xf32>
    %cst_164 = arith.constant 5.000000e-01 : f32
    %395 = vector.broadcast %cst_164 : f32 to vector<8x256xf32>
    %396 = arith.addf %394, %395 : vector<8x256xf32>
    %397 = vector.extract_strided_slice %396 {offsets = [0, 64], sizes = [8, 64], strides = [1, 1]} : vector<8x256xf32> to vector<8x64xf32>
    %398 = arith.mulf %397, %385 : vector<8x64xf32>
    %399 = vector.extract_strided_slice %396 {offsets = [0, 0], sizes = [8, 64], strides = [1, 1]} : vector<8x256xf32> to vector<8x64xf32>
    %400 = vector.extract_strided_slice %392 {offsets = [0, 128], sizes = [8, 64], strides = [1, 1]} : vector<8x256xf32> to vector<8x64xf32>
    %401 = arith.mulf %399, %400 : vector<8x64xf32>
    %402 = arith.addf %398, %401 : vector<8x64xf32>
    %403 = vector.extract_strided_slice %396 {offsets = [0, 192], sizes = [8, 64], strides = [1, 1]} : vector<8x256xf32> to vector<8x64xf32>
    %404 = math.tanh %402 : vector<8x64xf32>
    %405 = arith.mulf %403, %404 : vector<8x64xf32>
    %c48_165 = arith.constant 48 : index
    %c0_166 = arith.constant 0 : index
    %406 = vector.load %arg18[%c48_165, %c0_166] : memref<64x256xf32, #tpu.memory_space<vmem>>, vector<8x256xf32>
    %cst_167 = arith.constant dense<0.000000e+00> : vector<8x256xf32>
    %407 = tpu.matmul %405, %303, %cst_167 {dimension_numbers = #tpu.dot_dimension_numbers<[1], [0], [0], [1], [0, 0, 1, 1], [], []>} : vector<8x64xf32>, vector<64x256xf32>, vector<8x256xf32> -> vector<8x256xf32>
    %408 = arith.addf %406, %407 : vector<8x256xf32>
    %409 = math.tanh %408 : vector<8x256xf32>
    %cst_168 = arith.constant 5.000000e-01 : f32
    %410 = vector.broadcast %cst_168 : f32 to vector<8x256xf32>
    %411 = arith.mulf %410, %409 : vector<8x256xf32>
    %cst_169 = arith.constant 5.000000e-01 : f32
    %412 = vector.broadcast %cst_169 : f32 to vector<8x256xf32>
    %413 = arith.addf %411, %412 : vector<8x256xf32>
    %414 = vector.extract_strided_slice %413 {offsets = [0, 64], sizes = [8, 64], strides = [1, 1]} : vector<8x256xf32> to vector<8x64xf32>
    %415 = arith.mulf %414, %402 : vector<8x64xf32>
    %416 = vector.extract_strided_slice %413 {offsets = [0, 0], sizes = [8, 64], strides = [1, 1]} : vector<8x256xf32> to vector<8x64xf32>
    %417 = vector.extract_strided_slice %409 {offsets = [0, 128], sizes = [8, 64], strides = [1, 1]} : vector<8x256xf32> to vector<8x64xf32>
    %418 = arith.mulf %416, %417 : vector<8x64xf32>
    %419 = arith.addf %415, %418 : vector<8x64xf32>
    %420 = vector.extract_strided_slice %413 {offsets = [0, 192], sizes = [8, 64], strides = [1, 1]} : vector<8x256xf32> to vector<8x64xf32>
    %421 = math.tanh %419 : vector<8x64xf32>
    %422 = arith.mulf %420, %421 : vector<8x64xf32>
    %c56_170 = arith.constant 56 : index
    %c0_171 = arith.constant 0 : index
    %423 = vector.load %arg18[%c56_170, %c0_171] : memref<64x256xf32, #tpu.memory_space<vmem>>, vector<8x256xf32>
    %cst_172 = arith.constant dense<0.000000e+00> : vector<8x256xf32>
    %424 = tpu.matmul %422, %303, %cst_172 {dimension_numbers = #tpu.dot_dimension_numbers<[1], [0], [0], [1], [0, 0, 1, 1], [], []>} : vector<8x64xf32>, vector<64x256xf32>, vector<8x256xf32> -> vector<8x256xf32>
    %425 = arith.addf %423, %424 : vector<8x256xf32>
    %426 = math.tanh %425 : vector<8x256xf32>
    %cst_173 = arith.constant 5.000000e-01 : f32
    %427 = vector.broadcast %cst_173 : f32 to vector<8x256xf32>
    %428 = arith.mulf %427, %426 : vector<8x256xf32>
    %cst_174 = arith.constant 5.000000e-01 : f32
    %429 = vector.broadcast %cst_174 : f32 to vector<8x256xf32>
    %430 = arith.addf %428, %429 : vector<8x256xf32>
    %431 = vector.extract_strided_slice %430 {offsets = [0, 64], sizes = [8, 64], strides = [1, 1]} : vector<8x256xf32> to vector<8x64xf32>
    %432 = arith.mulf %431, %419 : vector<8x64xf32>
    %433 = vector.extract_strided_slice %430 {offsets = [0, 0], sizes = [8, 64], strides = [1, 1]} : vector<8x256xf32> to vector<8x64xf32>
    %434 = vector.extract_strided_slice %426 {offsets = [0, 128], sizes = [8, 64], strides = [1, 1]} : vector<8x256xf32> to vector<8x64xf32>
    %435 = arith.mulf %433, %434 : vector<8x64xf32>
    %436 = arith.addf %432, %435 : vector<8x64xf32>
    %437 = vector.extract_strided_slice %430 {offsets = [0, 192], sizes = [8, 64], strides = [1, 1]} : vector<8x256xf32> to vector<8x64xf32>
    %438 = math.tanh %436 : vector<8x64xf32>
    %439 = arith.mulf %437, %438 : vector<8x64xf32>
    %440 = vector.extract_strided_slice %240 {offsets = [0, 0], sizes = [8, 32], strides = [1, 1]} : vector<8x64xf32> to vector<8x32xf32>
    %c0_175 = arith.constant 0 : index
    %c0_176 = arith.constant 0 : index
    %c0_177 = arith.constant 0 : index
    %441 = vector.load %arg16[%c0_175, %c0_176, %c0_177] : memref<4x8x32xf32, #tpu.memory_space<vmem>>, vector<1x8x32xf32>
    %442 = vector.shape_cast %441 : vector<1x8x32xf32> to vector<8x32xf32>
    %443 = vector.shape_cast %440 : vector<8x32xf32> to vector<1x8x32xf32>
    tpu.vector_store %arg16[%c0_175, %c0_176, %c0_177], %443 {strides = array<i32>} : memref<4x8x32xf32, #tpu.memory_space<vmem>>, vector<1x8x32xf32>,
    %444 = vector.extract_strided_slice %240 {offsets = [0, 32], sizes = [8, 32], strides = [1, 1]} : vector<8x64xf32> to vector<8x32xf32>
    %c1_178 = arith.constant 1 : index
    %c0_179 = arith.constant 0 : index
    %c0_180 = arith.constant 0 : index
    %445 = vector.load %arg16[%c1_178, %c0_179, %c0_180] : memref<4x8x32xf32, #tpu.memory_space<vmem>>, vector<1x8x32xf32>
    %446 = vector.shape_cast %445 : vector<1x8x32xf32> to vector<8x32xf32>
    %447 = vector.shape_cast %444 : vector<8x32xf32> to vector<1x8x32xf32>
    tpu.vector_store %arg16[%c1_178, %c0_179, %c0_180], %447 {strides = array<i32>} : memref<4x8x32xf32, #tpu.memory_space<vmem>>, vector<1x8x32xf32>,
    %448 = vector.extract_strided_slice %439 {offsets = [0, 0], sizes = [8, 32], strides = [1, 1]} : vector<8x64xf32> to vector<8x32xf32>
    %c2 = arith.constant 2 : index
    %c0_181 = arith.constant 0 : index
    %c0_182 = arith.constant 0 : index
    %449 = vector.load %arg16[%c2, %c0_181, %c0_182] : memref<4x8x32xf32, #tpu.memory_space<vmem>>, vector<1x8x32xf32>
    %450 = vector.shape_cast %449 : vector<1x8x32xf32> to vector<8x32xf32>
    %451 = vector.shape_cast %448 : vector<8x32xf32> to vector<1x8x32xf32>
    tpu.vector_store %arg16[%c2, %c0_181, %c0_182], %451 {strides = array<i32>} : memref<4x8x32xf32, #tpu.memory_space<vmem>>, vector<1x8x32xf32>,
    %452 = vector.extract_strided_slice %439 {offsets = [0, 32], sizes = [8, 32], strides = [1, 1]} : vector<8x64xf32> to vector<8x32xf32>
    %c3 = arith.constant 3 : index
    %c0_183 = arith.constant 0 : index
    %c0_184 = arith.constant 0 : index
    %453 = vector.load %arg16[%c3, %c0_183, %c0_184] : memref<4x8x32xf32, #tpu.memory_space<vmem>>, vector<1x8x32xf32>
    %454 = vector.shape_cast %453 : vector<1x8x32xf32> to vector<8x32xf32>
    %455 = vector.shape_cast %452 : vector<8x32xf32> to vector<1x8x32xf32>
    tpu.vector_store %arg16[%c3, %c0_183, %c0_184], %455 {strides = array<i32>} : memref<4x8x32xf32, #tpu.memory_space<vmem>>, vector<1x8x32xf32>,
    %456 = vector.extract_strided_slice %237 {offsets = [0, 0], sizes = [8, 32], strides = [1, 1]} : vector<8x64xf32> to vector<8x32xf32>
    %c0_185 = arith.constant 0 : index
    %c0_186 = arith.constant 0 : index
    %c0_187 = arith.constant 0 : index
    %457 = vector.load %arg17[%c0_185, %c0_186, %c0_187] : memref<4x8x32xf32, #tpu.memory_space<vmem>>, vector<1x8x32xf32>
    %458 = vector.shape_cast %457 : vector<1x8x32xf32> to vector<8x32xf32>
    %459 = vector.shape_cast %456 : vector<8x32xf32> to vector<1x8x32xf32>
    tpu.vector_store %arg17[%c0_185, %c0_186, %c0_187], %459 {strides = array<i32>} : memref<4x8x32xf32, #tpu.memory_space<vmem>>, vector<1x8x32xf32>,
    %460 = vector.extract_strided_slice %237 {offsets = [0, 32], sizes = [8, 32], strides = [1, 1]} : vector<8x64xf32> to vector<8x32xf32>
    %c1_188 = arith.constant 1 : index
    %c0_189 = arith.constant 0 : index
    %c0_190 = arith.constant 0 : index
    %461 = vector.load %arg17[%c1_188, %c0_189, %c0_190] : memref<4x8x32xf32, #tpu.memory_space<vmem>>, vector<1x8x32xf32>
    %462 = vector.shape_cast %461 : vector<1x8x32xf32> to vector<8x32xf32>
    %463 = vector.shape_cast %460 : vector<8x32xf32> to vector<1x8x32xf32>
    tpu.vector_store %arg17[%c1_188, %c0_189, %c0_190], %463 {strides = array<i32>} : memref<4x8x32xf32, #tpu.memory_space<vmem>>, vector<1x8x32xf32>,
    %464 = vector.extract_strided_slice %436 {offsets = [0, 0], sizes = [8, 32], strides = [1, 1]} : vector<8x64xf32> to vector<8x32xf32>
    %c2_191 = arith.constant 2 : index
    %c0_192 = arith.constant 0 : index
    %c0_193 = arith.constant 0 : index
    %465 = vector.load %arg17[%c2_191, %c0_192, %c0_193] : memref<4x8x32xf32, #tpu.memory_space<vmem>>, vector<1x8x32xf32>
    %466 = vector.shape_cast %465 : vector<1x8x32xf32> to vector<8x32xf32>
    %467 = vector.shape_cast %464 : vector<8x32xf32> to vector<1x8x32xf32>
    tpu.vector_store %arg17[%c2_191, %c0_192, %c0_193], %467 {strides = array<i32>} : memref<4x8x32xf32, #tpu.memory_space<vmem>>, vector<1x8x32xf32>,
    %468 = vector.extract_strided_slice %436 {offsets = [0, 32], sizes = [8, 32], strides = [1, 1]} : vector<8x64xf32> to vector<8x32xf32>
    %c3_194 = arith.constant 3 : index
    %c0_195 = arith.constant 0 : index
    %c0_196 = arith.constant 0 : index
    %469 = vector.load %arg17[%c3_194, %c0_195, %c0_196] : memref<4x8x32xf32, #tpu.memory_space<vmem>>, vector<1x8x32xf32>
    %470 = vector.shape_cast %469 : vector<1x8x32xf32> to vector<8x32xf32>
    %471 = vector.shape_cast %468 : vector<8x32xf32> to vector<1x8x32xf32>
    tpu.vector_store %arg17[%c3_194, %c0_195, %c0_196], %471 {strides = array<i32>} : memref<4x8x32xf32, #tpu.memory_space<vmem>>, vector<1x8x32xf32>,
    %cst_197 = arith.constant dense<0.000000e+00> : vector<8xf32>
    %472 = vector.multi_reduction <add>, %439, %cst_197 [1] : vector<8x64xf32> to vector<8xf32>
    %473 = vector.shape_cast %472 : vector<8xf32> to vector<8x1xf32>
    %cst_198 = arith.constant 6.400000e+01 : f32
    %474 = vector.broadcast %cst_198 : f32 to vector<8x1xf32>
    %475 = arith.divf %473, %474 : vector<8x1xf32>
    %476 = vector.broadcast %475 : vector<8x1xf32> to vector<8x64xf32>
    %477 = arith.subf %439, %476 : vector<8x64xf32>
    %478 = arith.mulf %477, %477 : vector<8x64xf32>
    %cst_199 = arith.constant dense<0.000000e+00> : vector<8xf32>
    %479 = vector.multi_reduction <add>, %478, %cst_199 [1] : vector<8x64xf32> to vector<8xf32>
    %480 = vector.shape_cast %479 : vector<8xf32> to vector<8x1xf32>
    %cst_200 = arith.constant 6.400000e+01 : f32
    %481 = vector.broadcast %cst_200 : f32 to vector<8x1xf32>
    %482 = arith.divf %480, %481 : vector<8x1xf32>
    %cst_201 = arith.constant 1.000000e-03 : f32
    %483 = vector.broadcast %cst_201 : f32 to vector<8x1xf32>
    %484 = arith.addf %482, %483 : vector<8x1xf32>
    %485 = math.rsqrt %484 : vector<8x1xf32>
    %486 = vector.broadcast %485 : vector<8x1xf32> to vector<8x64xf32>
    %487 = arith.mulf %477, %486 : vector<8x64xf32>
    %c0_202 = arith.constant 0 : index
    %c0_203 = arith.constant 0 : index
    %488 = vector.load %arg11[%c0_202, %c0_203] : memref<1x64xf32, #tpu.memory_space<vmem>>, vector<1x64xf32>
    %489 = vector.broadcast %488 : vector<1x64xf32> to vector<8x64xf32>
    %490 = arith.mulf %487, %489 : vector<8x64xf32>
    %c0_204 = arith.constant 0 : index
    %c0_205 = arith.constant 0 : index
    %491 = vector.load %arg12[%c0_204, %c0_205] : memref<1x64xf32, #tpu.memory_space<vmem>>, vector<1x64xf32>
    %492 = vector.broadcast %491 : vector<1x64xf32> to vector<8x64xf32>
    %493 = arith.addf %490, %492 : vector<8x64xf32>
    %c0_206 = arith.constant 0 : index
    %c0_207 = arith.constant 0 : index
    %494 = vector.load %arg13[%c0_206, %c0_207] : memref<64x32xf32, #tpu.memory_space<vmem>>, vector<64x32xf32>
    %cst_208 = arith.constant dense<0.000000e+00> : vector<8x32xf32>
    %495 = tpu.matmul %493, %494, %cst_208 {dimension_numbers = #tpu.dot_dimension_numbers<[1], [0], [0], [1], [0, 0, 1, 1], [], []>} : vector<8x64xf32>, vector<64x32xf32>, vector<8x32xf32> -> vector<8x32xf32>
    %c0_209 = arith.constant 0 : index
    %c0_210 = arith.constant 0 : index
    %496 = vector.load %arg14[%c0_209, %c0_210] : memref<1x32xf32, #tpu.memory_space<vmem>>, vector<1x32xf32>
    %497 = vector.broadcast %496 : vector<1x32xf32> to vector<8x32xf32>
    %498 = arith.addf %495, %497 : vector<8x32xf32>
    %c0_211 = arith.constant 0 : index
    %c0_212 = arith.constant 0 : index
    %499 = vector.load %arg15[%c0_211, %c0_212] : memref<8x32xf32, #tpu.memory_space<vmem>>, vector<8x32xf32>
    tpu.vector_store %arg15[%c0_211, %c0_212], %498 {strides = array<i32>} : memref<8x32xf32, #tpu.memory_space<vmem>>, vector<8x32xf32>,
    return
  }
}

</mosaic_0001>

<bundles_post_ra>
// kernel: bidir_lstm_forward.1
= control target key start
LH: loop header
LB: loop body
LE: loop exit
PB: predicated region body
PF: predicated region fallthrough
CT: control target
= control target key end

     0   :  { %s4238_s0 = inlined_call_operand.vmem [shape: f32[64,32], index: 0, kind: input, shape index: {}]   ;;  %s4239_s1 = inlined_call_operand.vmem [shape: f32[2,8,64], index: 1, kind: input, shape index: {}]   ;;  %s4240_s2 = inlined_call_operand.vmem [shape: f32[2,8,64], index: 2, kind: input, shape index: {}]   ;;  %s4241_s3 = inlined_call_operand.vmem [shape: f32[32,256], index: 3, kind: input, shape index: {}]   ;;  %s4242_s4 = inlined_call_operand.vmem [shape: f32[32,256], index: 4, kind: input, shape index: {}]   ;;  %s4243_s5 = inlined_call_operand.vmem [shape: f32[64,256], index: 5, kind: input, shape index: {}]   ;;  %s4244_s6 = inlined_call_operand.vmem [shape: f32[1,256], index: 6, kind: input, shape index: {}]   ;;  %s4245_s7 = inlined_call_operand.vmem [shape: f32[64,256], index: 7, kind: input, shape index: {}]   ;;  %s4246_s8 = inlined_call_operand.vmem [shape: f32[64,256], index: 8, kind: input, shape index: {}]   ;;  %s4247_s9 = inlined_call_operand.vmem [shape: f32[64,256], index: 9, kind: input, shape index: {}]   ;;  %s4248_s10 = inlined_call_operand.vmem [shape: f32[1,256], index: 10, kind: input, shape index: {}]   ;;  %s4249_s11 = inlined_call_operand.vmem [shape: f32[1,64], index: 11, kind: input, shape index: {}]   ;;  %s4250_s12 = inlined_call_operand.vmem [shape: f32[1,64], index: 12, kind: input, shape index: {}]   ;;  %s4251_s13 = inlined_call_operand.vmem [shape: f32[64,32], index: 13, kind: input, shape index: {}]   ;;  %s4252_s14 = inlined_call_operand.vmem [shape: f32[1,32], index: 14, kind: input, shape index: {}]   ;;  %s4253_s15 = inlined_call_operand.hbm [shape: f32[8,32], index: 15, kind: output, shape index: {0}]   ;;  %s4254_s16 = inlined_call_operand.hbm [shape: f32[4,8,32], index: 16, kind: output, shape index: {1}]   ;;  %s4255_s17 = inlined_call_operand.hbm [shape: f32[4,8,32], index: 17, kind: output, shape index: {2}]  }
   0x1   :  { %4258 = sst [smem:[#allocation11_spill]] %s4238_s0 }
   0x2   :  { %4259 = sst [smem:[#allocation12_spill]] %s4239_s1 }
   0x3   :  { %23 = vsyncpa [#allocation5], 0  ;;  %s4260_s26 = sld [smem:[#allocation11_spill]]  ;;  %vm63_vm0 = vcmask 261120  }
   0x9   :  { %v55_v0 = vld [vmem:[%s4260_s26] sm:$0xff]  ;;  %v57_v1 = vld [vmem:[%s4260_s26 + $0x10] sm:$0xff]  ;;  %v56_v2 = vld [vmem:[%s4260_s26 + $0x8] sm:$0xff] }
   0xa   :  { %v64_v3 = vsel %vm63_vm0, %v55_v0, 0.0  ;;  %v70_v4 = vsel %vm63_vm0, %v57_v1, 0.0  ;;  %v58_v5 = vld [vmem:[%s4260_s26 + $0x18] sm:$0xff]  ;;  %v67_v6 = vsel %vm63_vm0, %v56_v2, 0.0 }
   0xb   :  { %65 = vadd.xlane.f32.xlu0 %v64_v3  ;;  %71 = vadd.xlane.f32.xlu1 %v70_v4  ;;  %v73_v7 = vsel %vm63_vm0, %v58_v5, 0.0 }
   0xc   :  { %24 = vsyncpa [#allocation7], 0  ;;  %v59_v8 = vld [vmem:[%s4260_s26 + $0x20] sm:$0xff]  ;;  %v60_v9 = vld [vmem:[%s4260_s26 + $0x28] sm:$0xff]  ;;  %v3336_v4 = vmov 0.0   ;;  %s3337_s18 = smov 64  }
   0xd   :  { %v76_v10 = vsel %vm63_vm0, %v59_v8, 0.0  ;;  %v79_v11 = vsel %vm63_vm0, %v60_v9, 0.0  ;;  %v61_v12 = vld [vmem:[%s4260_s26 + $0x30] sm:$0xff]  ;;  %v62_v13 = vld [vmem:[%s4260_s26 + $0x38] sm:$0xff]  ;;  %v170_v56 = vld [vmem:[%s4241_s3 + $0x8] sm:$0xff]  ;;  %265 = vmatprep.mubr.f32.mxu0 %v3336_v4  ;;  %1416 = vmatprep.mubr.f32.mxu1 %v3336_v4  ;;  %s4261_s30 = sld [smem:[#allocation12_spill]] }
   0xe   :  { %v82_v14 = vsel %vm63_vm0, %v61_v12, 0.0  ;;  %v85_v15 = vsel %vm63_vm0, %v62_v13, 0.0  ;;  %v172_v57 = vld [vmem:[%s4241_s3 + $0x18] sm:$0xff]  ;;  %v169_v59 = vld [vmem:[%s4241_s3] sm:$0xff]  ;;  %v171_v60 = vld [vmem:[%s4241_s3 + $0x10] sm:$0xff]  ;;  %vm515_vm1 = vcmask 523264  }
   0xf   :  { %68 = vadd.xlane.f32.xlu0 %v67_v6  ;;  %74 = vadd.xlane.f32.xlu1 %v73_v7  ;;  %v2730_v58 = vpack.c.bf16 %v172_v57, %v170_v56  ;;  %v2732_v61 = vpack.c.bf16 %v171_v60, %v169_v59  ;;  %v174_v62 = vld [vmem:[%s4241_s3 + $0x28] sm:$0xff]  ;;  %v176_v63 = vld [vmem:[%s4241_s3 + $0x38] sm:$0xff]  ;;  %vm616_vm2 = vcmask 523520   ;;  %vm3340_vm3 = vmmov 0  }
  0x10   :  { %v317_v6 = vld [vmem:[%s4242_s4 + $0x18] sm:$0xff] }
  0x11   :  { %2731 = vmatprep.subr.bf16.mxu0 %v2730_v58 }
  0x12   :  { %2733 = vmatpush1.bf16.msra.mxu0 %v2732_v61 }
  0x13   :  { %77 = vadd.xlane.f32.xlu0 %v76_v10  ;;  %80 = vadd.xlane.f32.xlu1 %v79_v11 }
  0x17   :  { %83 = vadd.xlane.f32.xlu0 %v82_v14  ;;  %86 = vadd.xlane.f32.xlu1 %v85_v15 }
  0x98   :  { %v66_v16 = vpop.xlane.xlu0 %65  ;;  %v72_v17 = vpop.xlane.xlu1 %71 }
  0x99   :  { %v89_v18 = vmul.f32 0.03125, %v66_v16  ;;  %v91_v19 = vmul.f32 0.03125, %v72_v17 }
  0x9b   :  { %v3468_v20 = vsub.f32 %v55_v0, %v89_v18  ;;  %v3470_v21 = vsub.f32 %v57_v1, %v91_v19  ;;  %v2734_v0 = vpack.c.bf16 %v176_v63, %v174_v62  ;;  %v173_v1 = vld [vmem:[%s4241_s3 + $0x20] sm:$0xff] }
  0x9c   :  { %v69_v22 = vpop.xlane.xlu0 %68  ;;  %v75_v23 = vpop.xlane.xlu1 %74 }
  0x9d   :  { %v90_v24 = vmul.f32 0.03125, %v69_v22  ;;  %v92_v25 = vmul.f32 0.03125, %v75_v23  ;;  %v105_v26 = vmul.f32 %v3468_v20, %v3468_v20  ;;  %v107_v27 = vmul.f32 %v3470_v21, %v3470_v21  ;;  %2735 = vmatprep.subr.bf16.mxu0 %v2734_v0  ;;  %v499_v0 = vld [vmem:[%s4243_s5 + $0x10] sm:$0xff] }
  0x9f   :  { %v3476_v28 = vsub.f32 %v56_v2, %v90_v24  ;;  %v3478_v29 = vsub.f32 %v58_v5, %v92_v25  ;;  %v113_v30 = vsel %vm63_vm0, %v105_v26, 0.0  ;;  %v119_v33 = vsel %vm63_vm0, %v107_v27, 0.0  ;;  %v175_v2 = vld [vmem:[%s4241_s3 + $0x30] sm:$0xff]  ;;  %v315_v5 = vld [vmem:[%s4242_s4 + $0x8] sm:$0xff]  ;;  %v314_v26 = vld [vmem:[%s4242_s4] sm:$0xff] }
  0xa0   :  { %114 = vadd.xlane.f32.xlu0 %v113_v30  ;;  %v78_v31 = vpop.xlane.xlu0 %77  ;;  %v81_v32 = vpop.xlane.xlu1 %80  ;;  %v2736_v3 = vpack.c.bf16 %v175_v2, %v173_v1  ;;  %v2738_v7 = vpack.c.bf16 %v317_v6, %v315_v5  ;;  %v316_v27 = vld [vmem:[%s4242_s4 + $0x10] sm:$0xff]  ;;  %v319_v30 = vld [vmem:[%s4242_s4 + $0x28] sm:$0xff] }
  0xa1   :  { %v93_v34 = vmul.f32 0.03125, %v78_v31  ;;  %v94_v35 = vmul.f32 0.03125, %v81_v32  ;;  %v106_v36 = vmul.f32 %v3476_v28, %v3476_v28  ;;  %v108_v37 = vmul.f32 %v3478_v29, %v3478_v29  ;;  %v321_v31 = vld [vmem:[%s4242_s4 + $0x38] sm:$0xff]  ;;  %v503_v5 = vld [vmem:[%s4243_s5 + $0x30] sm:$0xff]  ;;  %v506_v6 = vld [vmem:[%s4243_s5 + $0x48] sm:$0xff] }
  0xa2   :  { %2737 = vmatpush1.bf16.msra.mxu0 %v2736_v3  ;;  %v501_v3 = vld [vmem:[%s4243_s5 + $0x20] sm:$0xff] }
  0xa3   :  { %v3486_v38 = vsub.f32 %v59_v8, %v93_v34  ;;  %v3488_v39 = vsub.f32 %v60_v9, %v94_v35  ;;  %v116_v40 = vsel %vm63_vm0, %v106_v36, 0.0  ;;  %v122_v43 = vsel %vm63_vm0, %v108_v37, 0.0  ;;  %2739 = vmatprep.subr.bf16.mxu0 %v2738_v7  ;;  %v496_v8 = vld [vmem:[%s4240_s2] sm:$0xff]  ;;  %v508_v7 = vld [vmem:[%s4243_s5 + $0x58] sm:$0xff] }
  0xa4   :  { %120 = vadd.xlane.f32.xlu0 %v119_v33  ;;  %117 = vadd.xlane.f32.xlu1 %v116_v40  ;;  %v84_v41 = vpop.xlane.xlu0 %83  ;;  %v87_v42 = vpop.xlane.xlu1 %86  ;;  %v2740_v35 = vpack.c.bf16 %v316_v27, %v314_v26  ;;  %v2742_v40 = vpack.c.bf16 %v321_v31, %v319_v30 }
  0xa5   :  { %v95_v44 = vmul.f32 0.03125, %v84_v41  ;;  %v96_v45 = vmul.f32 0.03125, %v87_v42  ;;  %v109_v46 = vmul.f32 %v3486_v38, %v3486_v38  ;;  %v110_v47 = vmul.f32 %v3488_v39, %v3488_v39  ;;  %v318_v41 = vld [vmem:[%s4242_s4 + $0x20] sm:$0xff]  ;;  %v320_v42 = vld [vmem:[%s4242_s4 + $0x30] sm:$0xff] }
  0xa7   :  { %v3496_v48 = vsub.f32 %v61_v12, %v95_v44  ;;  %v3498_v49 = vsub.f32 %v62_v13, %v96_v45  ;;  %v125_v50 = vsel %vm63_vm0, %v109_v46, 0.0  ;;  %v128_v51 = vsel %vm63_vm0, %v110_v47, 0.0  ;;  %v500_v44 = vld [vmem:[%s4243_s5 + $0x18] sm:$0xff] }
  0xa8   :  { %123 = vadd.xlane.f32.xlu1 %v122_v43  ;;  %126 = vadd.xlane.f32.xlu0 %v125_v50  ;;  %v498_v43 = vld [vmem:[%s4243_s5 + $0x8] sm:$0xff]  ;;  %v2744_v47 = vpack.c.bf16 %v320_v42, %v318_v41 }
  0xa9   :  { %v111_v52 = vmul.f32 %v3496_v48, %v3496_v48  ;;  %v112_v53 = vmul.f32 %v3498_v49, %v3498_v49 }
  0xab   :  { %v131_v54 = vsel %vm63_vm0, %v111_v52, 0.0  ;;  %v134_v55 = vsel %vm63_vm0, %v112_v53, 0.0  ;;  %v3572_v52 = vpack.c.bf16 %v500_v44, %v498_v43 }
  0xac   :  { %129 = vadd.xlane.f32.xlu1 %v128_v51  ;;  %132 = vadd.xlane.f32.xlu0 %v131_v54 }
  0xb0   :  { %135 = vadd.xlane.f32.xlu1 %v134_v55 }
  0xc2   :  { %599 = vrot.lane.b32.xlu0 %v496_v8, %s3337_s18  ;;  %v3626_v8 = vpack.c.bf16 %v503_v5, %v501_v3 }
 0x12d   :  { %v115_v9 = vpop.xlane.xlu0 %114 }
 0x12e   :  { %v137_v10 = vmul.f32 0.03125, %v115_v9  ;;  %v3629_v9 = vpack.c.bf16 %v508_v7, %v506_v6 }
 0x130   :  { %v145_v11 = vadd.f32 0.001, %v137_v10  ;;  %v505_v10 = vld [vmem:[%s4243_s5 + $0x40] sm:$0xff] }
 0x131   :  { %v118_v12 = vpop.xlane.xlu1 %117  ;;  %v121_v13 = vpop.xlane.xlu0 %120 }
 0x132   :  { %3152 = vrsqrt.f32 %v145_v11  ;;  %v138_v14 = vmul.f32 0.03125, %v118_v12  ;;  %v139_v15 = vmul.f32 0.03125, %v121_v13  ;;  %v507_v11 = vld [vmem:[%s4243_s5 + $0x50] sm:$0xff]  ;;  %v510_v12 = vld [vmem:[%s4243_s5 + $0x68] sm:$0xff]  ;;  %v512_v13 = vld [vmem:[%s4243_s5 + $0x78] sm:$0xff] }
 0x134   :  { %v146_v16 = vadd.f32 0.001, %v138_v14  ;;  %v147_v17 = vadd.f32 0.001, %v139_v15  ;;  %v3646_v14 = vpack.c.bf16 %v507_v11, %v505_v10  ;;  %v3649_v15 = vpack.c.bf16 %v512_v13, %v510_v12 }
 0x135   :  { %v124_v18 = vpop.xlane.xlu1 %123  ;;  %v127_v19 = vpop.xlane.xlu0 %126 }
 0x136   :  { %3154 = vrsqrt.f32 %v146_v16  ;;  %v140_v22 = vmul.f32 0.03125, %v124_v18  ;;  %v141_v24 = vmul.f32 0.03125, %v127_v19  ;;  %v509_v16 = vld [vmem:[%s4243_s5 + $0x60] sm:$0xff] }
 0x137   :  { %3156 = vrsqrt.f32 %v147_v17  ;;  %v511_v17 = vld [vmem:[%s4243_s5 + $0x70] sm:$0xff]  ;;  %v495_v19 = vld [vmem:[%s4261_s30] sm:$0xff] }
 0x138   :  { %v148_v23 = vadd.f32 0.001, %v140_v22  ;;  %v149_v33 = vadd.f32 0.001, %v141_v24  ;;  %v3660_v18 = vpack.c.bf16 %v511_v17, %v509_v16  ;;  %v439_v22 = vlaneseq }
 0x139   :  { %v130_v25 = vpop.xlane.xlu1 %129  ;;  %v133_v36 = vpop.xlane.xlu0 %132 }
 0x13a   :  { %3158 = vrsqrt.f32 %v148_v23  ;;  %v142_v34 = vmul.f32 0.03125, %v130_v25  ;;  %v143_v46 = vmul.f32 0.03125, %v133_v36  ;;  %v3688_v23 = vshrl.u32 %v439_v22, 7  ;;  %v435_v25 = vld [vmem:[%s4244_s6] sm:$0x3] }
 0x13b   :  { %3160 = vrsqrt.f32 %v149_v33 }
 0x13c   :  { %v3153_v32 = vpop.eup %3152  ;;  %v150_v45 = vadd.f32 0.001, %v142_v34  ;;  %v151_v54 = vadd.f32 0.001, %v143_v46  ;;  %v441_v24 = vsub.s32 0, %v3688_v23  ;;  %v445_v26 = vsub.s32 1, %v3688_v23 }
 0x13d   :  { %v161_v37 = vmul.f32 %v3153_v32, %v3468_v20  ;;  %v136_v50 = vpop.xlane.xlu1 %135  ;;  %v600_v42 = vpop.permute.xlu0 %599 }
 0x13e   :  { %3162 = vrsqrt.f32 %v150_v45  ;;  %v144_v55 = vmul.f32 0.03125, %v136_v50  ;;  %v3697_v27 = vrot.slane %v435_v25, %v441_v24  ;;  %v3701_v30 = vrot.slane %v435_v25, %v445_v26 }
 0x13f   :  { %2648 = vmatmul.mubr.msk.f32.vlgmr.msra.gmra.mrb[0].mxu0 %vm63_vm0, %v161_v37  ;;  %3164 = vrsqrt.f32 %v151_v54 }
 0x140   :  { %v3155_v20 = vpop.eup %3154  ;;  %2741 = vmatpush1.bf16.msra.mxu0 %v2740_v35  ;;  %271 = vmatprep.mubr.f32.mxu0 %v3336_v4 }
 0x141   :  { %v162_v51 = vmul.f32 %v3155_v20, %v3476_v28  ;;  %2743 = vmatprep.subr.bf16.mxu0 %v2742_v40  ;;  %v3157_v53 = vpop.eup %3156  ;;  %v152_v28 = vadd.f32 0.001, %v144_v55 }
 0x142   :  { %v163_v56 = vmul.f32 %v3157_v53, %v3470_v21 }
 0x143   :  { %2649 = vmatmul.mubr.msk.f32.gmra.mrb[2].mxu0 %vm63_vm0, %v162_v51  ;;  %3166 = vrsqrt.f32 %v152_v28 }
 0x144   :  { %277 = vmatprep.mubr.f32.mxu0 %v3336_v4  ;;  %2745 = vmatpush1.bf16.msra.mxu0 %v2744_v47  ;;  %v3159_v57 = vpop.eup %3158 }
 0x145   :  { %2747 = vmatprep.subr.bf16.mxu0 %v3572_v52  ;;  %v164_v58 = vmul.f32 %v3159_v57, %v3478_v29  ;;  %v3161_v59 = vpop.eup %3160 }
 0x146   :  { %v165_v60 = vmul.f32 %v3161_v59, %v3486_v38 }
 0x147   :  { %2650 = vmatmul.mubr.msk.f32.gmra.mrb[4].mxu0 %vm63_vm0, %v163_v56 }
 0x148   :  { %283 = vmatprep.mubr.f32.mxu0 %v3336_v4  ;;  %v3163_v21 = vpop.eup %3162 }
 0x149   :  { %v166_v61 = vmul.f32 %v3163_v21, %v3488_v39  ;;  %v3165_v62 = vpop.eup %3164  ;;  %v497_v39 = vld [vmem:[%s4243_s5] sm:$0xff] }
 0x14a   :  { %v167_v29 = vmul.f32 %v3165_v62, %v3496_v48  ;;  %v502_v48 = vld [vmem:[%s4243_s5 + $0x28] sm:$0xff]  ;;  %v3607_v1 = vpack.c.bf16 %v499_v0, %v497_v39 }
 0x14b   :  { %2651 = vmatmul.mubr.msk.f32.gmra.mrb[6].mxu0 %vm63_vm0, %v164_v58 }
 0x14c   :  { %289 = vmatprep.mubr.f32.mxu0 %v3336_v4 }
 0x14d   :  { %v3167_v63 = vpop.eup %3166 }
 0x14e   :  { %v168_v38 = vmul.f32 %v3167_v63, %v3498_v49  ;;  %v504_v49 = vld [vmem:[%s4243_s5 + $0x38] sm:$0xff] }
 0x14f   :  { %2652 = vmatmul.mubr.msk.f32.gmra.mrb[8].mxu0 %vm63_vm0, %v165_v60  ;;  %v3609_v2 = vpack.c.bf16 %v504_v49, %v502_v48 }
 0x150   :  { %295 = vmatprep.mubr.f32.mxu0 %v3336_v4 }
 0x153   :  { %2653 = vmatmul.mubr.msk.f32.gmra.mrb[10].mxu0 %vm63_vm0, %v166_v61 }
 0x154   :  { %301 = vmatprep.mubr.f32.mxu0 %v3336_v4 }
 0x157   :  { %2654 = vmatmul.mubr.msk.f32.gmra.mrb[12].mxu0 %vm63_vm0, %v167_v29 }
 0x158   :  { %307 = vmatprep.mubr.f32.mxu0 %v3336_v4 }
 0x15b   :  { %2655 = vmatmul.mubr.msk.f32.gmra.mrb[14].mxu0 %vm63_vm0, %v168_v38 }
 0x15c   :  { %386 = vmatprep.mubr.f32.mxu0 %v3336_v4 }
 0x163   :  { %2656 = vmatmul.mubr.msk.f32.vlgmr.msra.gmra.mrb[14].mxu0 %vm63_vm0, %v161_v37 }
 0x164   :  { %2749 = vmatpush1.bf16.msra.mxu0 %v3607_v1  ;;  %392 = vmatprep.mubr.f32.mxu0 %v3336_v4 }
 0x165   :  { %2751 = vmatprep.subr.bf16.mxu0 %v3609_v2 }
 0x167   :  { %2657 = vmatmul.mubr.msk.f32.gmra.mrb[12].mxu0 %vm63_vm0, %v162_v51 }
 0x168   :  { %398 = vmatprep.mubr.f32.mxu0 %v3336_v4  ;;  %2753 = vmatpush1.bf16.msra.mxu0 %v3626_v8 }
 0x169   :  { %2755 = vmatprep.subr.bf16.mxu0 %v3629_v9 }
 0x16b   :  { %2658 = vmatmul.mubr.msk.f32.gmra.mrb[10].mxu0 %vm63_vm0, %v163_v56 }
 0x16c   :  { %404 = vmatprep.mubr.f32.mxu0 %v3336_v4  ;;  %2757 = vmatpush1.bf16.msra.mxu0 %v3646_v14 }
 0x16d   :  { %2759 = vmatprep.subr.bf16.mxu0 %v3649_v15 }
 0x16f   :  { %2659 = vmatmul.mubr.msk.f32.gmra.mrb[8].mxu0 %vm63_vm0, %v164_v58 }
 0x170   :  { %410 = vmatprep.mubr.f32.mxu0 %v3336_v4  ;;  %2761 = vmatpush1.bf16.msra.mxu0 %v3660_v18 }
 0x171   :  { %2763 = vmatprep.subr.bf16.mxu0 %v3572_v52 }
 0x173   :  { %2660 = vmatmul.mubr.msk.f32.gmra.mrb[6].mxu0 %vm63_vm0, %v165_v60 }
 0x174   :  { %416 = vmatprep.mubr.f32.mxu0 %v3336_v4 }
 0x177   :  { %2661 = vmatmul.mubr.msk.f32.gmra.mrb[4].mxu0 %vm63_vm0, %v166_v61 }
 0x178   :  { %422 = vmatprep.mubr.f32.mxu0 %v3336_v4 }
 0x17b   :  { %2662 = vmatmul.mubr.msk.f32.gmra.mrb[2].mxu0 %vm63_vm0, %v167_v29 }
 0x17c   :  { %428 = vmatprep.mubr.f32.mxu0 %v3336_v4 }
 0x17f   :  { %2663 = vmatmul.mubr.msk.f32.gmra.mrb[0].mxu0 %vm63_vm0, %v168_v38 }
 0x180   :  { %583 = vmatprep.mubr.f32.mxu0 %v3336_v4 }
 0x187   :  { %2664 = vmatmul.mubr.msk.f32.vlgmr.msra.gmra.mrb[0].mxu0 %vm515_vm1, %v495_v19 }
 0x188   :  { %2765 = vmatpush1.bf16.msra.mxu0 %v3607_v1  ;;  %686 = vmatprep.mubr.f32.mxu0 %v3336_v4 }
 0x189   :  { %2767 = vmatprep.subr.bf16.mxu0 %v3609_v2 }
 0x18c   :  { %2769 = vmatpush1.bf16.msra.mxu0 %v3626_v8 }
 0x18d   :  { %2771 = vmatprep.subr.bf16.mxu0 %v3629_v9 }
 0x190   :  { %2773 = vmatpush1.bf16.msra.mxu0 %v3646_v14 }
 0x191   :  { %2775 = vmatprep.subr.bf16.mxu0 %v3649_v15 }
 0x194   :  { %2777 = vmatpush1.bf16.msra.mxu0 %v3660_v18 }
 0x195   :  { %2779 = vmatprep.subr.bf16.mxu0 %v3572_v52 }
 0x25a   :  { %v585_v31 = vpop.f32.mrb[0].mxu0 }
 0x25b   :  { %v3046_v32 = vadd.f32 %v585_v31, %v3697_v27  ;;  %v587_v33 = vpop.f32.mrb[1].mxu0 }
 0x25c   :  { %v3047_v34 = vadd.f32 %v587_v33, %v3701_v30 }
 0x25d   :  { %3168 = vtanh.f32 %v3046_v32 }
 0x25e   :  { %3170 = vtanh.f32 %v3047_v34 }
 0x267   :  { %v3169_v35 = vpop.eup %3168 }
 0x268   :  { %v594_v36 = vmul.f32 0.5, %v3169_v35  ;;  %v3171_v40 = vpop.eup %3170 }
 0x269   :  { %v595_v45 = vmul.f32 0.5, %v3171_v40 }
 0x26a   :  { %v596_v37 = vadd.f32 0.5, %v594_v36 }
 0x26b   :  { %v597_v46 = vadd.f32 0.5, %v595_v45 }
 0x26c   :  { %v603_v41 = vmul.f32 %v3171_v40, %v596_v37  ;;  %v602_v43 = vmul.f32 %v600_v42, %v596_v37 }
 0x26e   :  { %605 = vrot.lane.b32.xlu1 %v603_v41, %s3337_s18 }
 0x2e0   :  { %v606_v44 = vpop.permute.xlu1 %605 }
 0x2e1   :  { %v608_v20 = vadd.f32 %v606_v44, %v602_v43 }
 0x2e3   :  { %3172 = vtanh.f32 %v608_v20 }
 0x2ed   :  { %v3173_v47 = vpop.eup %3172 }
 0x2ee   :  { %v610_v50 = vmul.f32 %v3173_v47, %v597_v46 }
 0x2f0   :  { %612 = vrot.lane.b32.xlu1 %v610_v50, %s3337_s18 }
 0x362   :  { %v613_v51 = vpop.permute.xlu1 %612 }
 0x363   :  { %615 = vst.msk [vmem:[#allocation3] sm:$0xff] %vm63_vm0, %v613_v51  ;;  %2665 = vmatmul.mubr.msk.f32.vlgmr.msra.gmra.mrb[2].mxu0 %vm515_vm1, %v613_v51 }
 0x364   :  { %617 = vst.msk [vmem:[#allocation3 + $0x38] sm:$0xff] %vm616_vm2, %v613_v51  ;;  %2781 = vmatpush1.bf16.msra.mxu0 %v3607_v1  ;;  %784 = vmatprep.mubr.f32.mxu0 %v3336_v4 }
 0x365   :  { %2783 = vmatprep.subr.bf16.mxu0 %v3609_v2 }
 0x368   :  { %2785 = vmatpush1.bf16.msra.mxu0 %v3626_v8 }
 0x369   :  { %2787 = vmatprep.subr.bf16.mxu0 %v3629_v9 }
 0x36c   :  { %2789 = vmatpush1.bf16.msra.mxu0 %v3646_v14 }
 0x36d   :  { %2791 = vmatprep.subr.bf16.mxu0 %v3649_v15 }
 0x370   :  { %2793 = vmatpush1.bf16.msra.mxu0 %v3660_v18 }
 0x371   :  { %2795 = vmatprep.subr.bf16.mxu0 %v3572_v52 }
 0x436   :  { %v688_v53 = vpop.f32.mrb[2].mxu0 }
 0x437   :  { %v3048_v54 = vadd.f32 %v688_v53, %v3697_v27  ;;  %v690_v55 = vpop.f32.mrb[3].mxu0 }
 0x438   :  { %v3049_v56 = vadd.f32 %v690_v55, %v3701_v30 }
 0x439   :  { %3174 = vtanh.f32 %v3048_v54 }
 0x43a   :  { %3176 = vtanh.f32 %v3049_v56 }
 0x443   :  { %v3175_v57 = vpop.eup %3174 }
 0x444   :  { %v697_v28 = vmul.f32 0.5, %v3175_v57  ;;  %v3177_v59 = vpop.eup %3176 }
 0x445   :  { %v698_v29 = vmul.f32 0.5, %v3177_v59 }
 0x446   :  { %v699_v58 = vadd.f32 0.5, %v697_v28 }
 0x447   :  { %v700_v63 = vadd.f32 0.5, %v698_v29 }
 0x448   :  { %v702_v60 = vmul.f32 %v3177_v59, %v699_v58  ;;  %v701_v21 = vmul.f32 %v699_v58, %v608_v20 }
 0x44a   :  { %704 = vrot.lane.b32.xlu1 %v702_v60, %s3337_s18 }
 0x4bc   :  { %v705_v61 = vpop.permute.xlu1 %704 }
 0x4bd   :  { %v707_v62 = vadd.f32 %v705_v61, %v701_v21 }
 0x4bf   :  { %3178 = vtanh.f32 %v707_v62 }
 0x4c9   :  { %v3179_v38 = vpop.eup %3178 }
 0x4ca   :  { %v709_v39 = vmul.f32 %v3179_v38, %v700_v63 }
 0x4cc   :  { %711 = vrot.lane.b32.xlu0 %v709_v39, %s3337_s18 }
 0x53e   :  { %v712_v0 = vpop.permute.xlu0 %711 }
 0x53f   :  { %714 = vst.msk [vmem:[#allocation3 + $0x8] sm:$0xff] %vm63_vm0, %v712_v0  ;;  %2666 = vmatmul.mubr.msk.f32.vlgmr.msra.gmra.mrb[4].mxu0 %vm515_vm1, %v712_v0 }
 0x540   :  { %715 = vst.msk [vmem:[#allocation3 + $0x30] sm:$0xff] %vm616_vm2, %v712_v0  ;;  %2797 = vmatpush1.bf16.msra.mxu0 %v3607_v1  ;;  %882 = vmatprep.mubr.f32.mxu0 %v3336_v4 }
 0x541   :  { %2799 = vmatprep.subr.bf16.mxu0 %v3609_v2 }
 0x544   :  { %2801 = vmatpush1.bf16.msra.mxu0 %v3626_v8 }
 0x545   :  { %2803 = vmatprep.subr.bf16.mxu0 %v3629_v9 }
 0x548   :  { %2805 = vmatpush1.bf16.msra.mxu0 %v3646_v14 }
 0x549   :  { %2807 = vmatprep.subr.bf16.mxu0 %v3649_v15 }
 0x54c   :  { %2809 = vmatpush1.bf16.msra.mxu0 %v3660_v18 }
 0x54d   :  { %2811 = vmatprep.subr.bf16.mxu0 %v3572_v52 }
 0x612   :  { %v786_v48 = vpop.f32.mrb[4].mxu0 }
 0x613   :  { %v3050_v49 = vadd.f32 %v786_v48, %v3697_v27  ;;  %v788_v3 = vpop.f32.mrb[5].mxu0 }
 0x614   :  { %v3051_v5 = vadd.f32 %v788_v3, %v3701_v30 }
 0x615   :  { %3180 = vtanh.f32 %v3050_v49 }
 0x616   :  { %3182 = vtanh.f32 %v3051_v5 }
 0x61f   :  { %v3181_v6 = vpop.eup %3180 }
 0x620   :  { %v795_v7 = vmul.f32 0.5, %v3181_v6  ;;  %v3183_v11 = vpop.eup %3182 }
 0x621   :  { %v796_v19 = vmul.f32 0.5, %v3183_v11 }
 0x622   :  { %v797_v10 = vadd.f32 0.5, %v795_v7 }
 0x623   :  { %v798_v22 = vadd.f32 0.5, %v796_v19 }
 0x624   :  { %v800_v12 = vmul.f32 %v3183_v11, %v797_v10  ;;  %v799_v13 = vmul.f32 %v797_v10, %v707_v62 }
 0x626   :  { %802 = vrot.lane.b32.xlu1 %v800_v12, %s3337_s18 }
 0x698   :  { %v803_v16 = vpop.permute.xlu1 %802 }
 0x699   :  { %v805_v17 = vadd.f32 %v803_v16, %v799_v13 }
 0x69b   :  { %3184 = vtanh.f32 %v805_v17 }
 0x6a5   :  { %v3185_v25 = vpop.eup %3184 }
 0x6a6   :  { %v807_v31 = vmul.f32 %v3185_v25, %v798_v22 }
 0x6a8   :  { %809 = vrot.lane.b32.xlu0 %v807_v31, %s3337_s18 }
 0x71a   :  { %v810_v32 = vpop.permute.xlu0 %809 }
 0x71b   :  { %812 = vst.msk [vmem:[#allocation3 + $0x10] sm:$0xff] %vm63_vm0, %v810_v32  ;;  %2667 = vmatmul.mubr.msk.f32.vlgmr.msra.gmra.mrb[6].mxu0 %vm515_vm1, %v810_v32 }
 0x71c   :  { %813 = vst.msk [vmem:[#allocation3 + $0x28] sm:$0xff] %vm616_vm2, %v810_v32  ;;  %2813 = vmatpush1.bf16.msra.mxu0 %v3607_v1  ;;  %980 = vmatprep.mubr.f32.mxu0 %v3336_v4 }
 0x71d   :  { %2815 = vmatprep.subr.bf16.mxu0 %v3609_v2 }
 0x720   :  { %2817 = vmatpush1.bf16.msra.mxu0 %v3626_v8 }
 0x721   :  { %2819 = vmatprep.subr.bf16.mxu0 %v3629_v9 }
 0x724   :  { %2821 = vmatpush1.bf16.msra.mxu0 %v3646_v14 }
 0x725   :  { %2823 = vmatprep.subr.bf16.mxu0 %v3649_v15 }
 0x728   :  { %2825 = vmatpush1.bf16.msra.mxu0 %v3660_v18 }
 0x729   :  { %2827 = vmatprep.subr.bf16.mxu0 %v3572_v52 }
 0x7ee   :  { %v884_v33 = vpop.f32.mrb[6].mxu0 }
 0x7ef   :  { %v3052_v34 = vadd.f32 %v884_v33, %v3697_v27  ;;  %v886_v35 = vpop.f32.mrb[7].mxu0 }
 0x7f0   :  { %v3053_v36 = vadd.f32 %v886_v35, %v3701_v30 }
 0x7f1   :  { %3186 = vtanh.f32 %v3052_v34 }
 0x7f2   :  { %3188 = vtanh.f32 %v3053_v36 }
 0x7fb   :  { %v3187_v37 = vpop.eup %3186 }
 0x7fc   :  { %v893_v40 = vmul.f32 0.5, %v3187_v37  ;;  %v3189_v42 = vpop.eup %3188 }
 0x7fd   :  { %v894_v46 = vmul.f32 0.5, %v3189_v42 }
 0x7fe   :  { %v895_v41 = vadd.f32 0.5, %v893_v40 }
 0x7ff   :  { %v896_v47 = vadd.f32 0.5, %v894_v46 }
 0x800   :  { %v898_v43 = vmul.f32 %v3189_v42, %v895_v41  ;;  %v897_v44 = vmul.f32 %v895_v41, %v805_v17 }
 0x802   :  { %900 = vrot.lane.b32.xlu1 %v898_v43, %s3337_s18 }
 0x874   :  { %v901_v20 = vpop.permute.xlu1 %900 }
 0x875   :  { %v903_v45 = vadd.f32 %v901_v20, %v897_v44 }
 0x877   :  { %3190 = vtanh.f32 %v903_v45 }
 0x881   :  { %v3191_v50 = vpop.eup %3190 }
 0x882   :  { %v905_v51 = vmul.f32 %v3191_v50, %v896_v47 }
 0x884   :  { %907 = vrot.lane.b32.xlu0 %v905_v51, %s3337_s18 }
 0x8f6   :  { %v908_v53 = vpop.permute.xlu0 %907 }
 0x8f7   :  { %910 = vst.msk [vmem:[#allocation3 + $0x18] sm:$0xff] %vm63_vm0, %v908_v53  ;;  %2668 = vmatmul.mubr.msk.f32.vlgmr.msra.gmra.mrb[8].mxu0 %vm515_vm1, %v908_v53 }
 0x8f8   :  { %911 = vst.msk [vmem:[#allocation3 + $0x20] sm:$0xff] %vm616_vm2, %v908_v53  ;;  %2829 = vmatpush1.bf16.msra.mxu0 %v3607_v1  ;;  %1078 = vmatprep.mubr.f32.mxu0 %v3336_v4 }
 0x8f9   :  { %2831 = vmatprep.subr.bf16.mxu0 %v3609_v2 }
 0x8fc   :  { %2833 = vmatpush1.bf16.msra.mxu0 %v3626_v8 }
 0x8fd   :  { %2835 = vmatprep.subr.bf16.mxu0 %v3629_v9 }
 0x900   :  { %2837 = vmatpush1.bf16.msra.mxu0 %v3646_v14 }
 0x901   :  { %2839 = vmatprep.subr.bf16.mxu0 %v3649_v15 }
 0x904   :  { %2841 = vmatpush1.bf16.msra.mxu0 %v3660_v18 }
 0x905   :  { %2843 = vmatprep.subr.bf16.mxu0 %v3572_v52 }
 0x9ca   :  { %v982_v54 = vpop.f32.mrb[8].mxu0 }
 0x9cb   :  { %v3054_v55 = vadd.f32 %v982_v54, %v3697_v27  ;;  %v984_v56 = vpop.f32.mrb[9].mxu0 }
 0x9cc   :  { %v3055_v57 = vadd.f32 %v984_v56, %v3701_v30  ;;  %v1313_v56 = vld [vmem:[%s4245_s7 + $0x8] sm:$0xff] }
 0x9cd   :  { %3192 = vtanh.f32 %v3054_v55 }
 0x9ce   :  { %3194 = vtanh.f32 %v3055_v57 }
 0x9d7   :  { %v3193_v28 = vpop.eup %3192 }
 0x9d8   :  { %v991_v58 = vmul.f32 0.5, %v3193_v28  ;;  %v3195_v60 = vpop.eup %3194  ;;  %v1314_v28 = vld [vmem:[%s4245_s7 + $0x10] sm:$0xff] }
 0x9d9   :  { %v992_v63 = vmul.f32 0.5, %v3195_v60 }
 0x9da   :  { %v993_v59 = vadd.f32 0.5, %v991_v58  ;;  %v1317_v58 = vld [vmem:[%s4245_s7 + $0x28] sm:$0xff] }
 0x9db   :  { %v994_v38 = vadd.f32 0.5, %v992_v63  ;;  %v1323_v63 = vld [vmem:[%s4245_s7 + $0x58] sm:$0xff] }
 0x9dc   :  { %v996_v21 = vmul.f32 %v3195_v60, %v993_v59  ;;  %v995_v61 = vmul.f32 %v993_v59, %v903_v45  ;;  %v1319_v59 = vld [vmem:[%s4245_s7 + $0x38] sm:$0xff] }
 0x9de   :  { %998 = vrot.lane.b32.xlu1 %v996_v21, %s3337_s18  ;;  %v2878_v21 = vpack.c.bf16 %v1319_v59, %v1317_v58 }
 0xa50   :  { %v999_v62 = vpop.permute.xlu1 %998 }
 0xa51   :  { %v1001_v29 = vadd.f32 %v999_v62, %v995_v61  ;;  %v1316_v61 = vld [vmem:[%s4245_s7 + $0x20] sm:$0xff]  ;;  %v1318_v62 = vld [vmem:[%s4245_s7 + $0x30] sm:$0xff] }
 0xa53   :  { %3196 = vtanh.f32 %v1001_v29 }
 0xa5d   :  { %v3197_v39 = vpop.eup %3196 }
 0xa5e   :  { %v1003_v0 = vmul.f32 %v3197_v39, %v994_v38  ;;  %v2880_v38 = vpack.c.bf16 %v1318_v62, %v1316_v61  ;;  %v1660_v61 = vld [vmem:[%s4247_s9 + $0x10] sm:$0xff]  ;;  %v1663_v62 = vld [vmem:[%s4247_s9 + $0x28] sm:$0xff] }
 0xa60   :  { %1005 = vrot.lane.b32.xlu0 %v1003_v0, %s3337_s18 }
 0xad2   :  { %v1006_v48 = vpop.permute.xlu0 %1005 }
 0xad3   :  { %1008 = vst.msk [vmem:[#allocation3 + $0x20] sm:$0xff] %vm63_vm0, %v1006_v48  ;;  %2669 = vmatmul.mubr.msk.f32.vlgmr.msra.gmra.mrb[10].mxu0 %vm515_vm1, %v1006_v48 }
 0xad4   :  { %1009 = vst.msk [vmem:[#allocation3 + $0x18] sm:$0xff] %vm616_vm2, %v1006_v48  ;;  %2845 = vmatpush1.bf16.msra.mxu0 %v3607_v1  ;;  %1176 = vmatprep.mubr.f32.mxu0 %v3336_v4 }
 0xad5   :  { %2847 = vmatprep.subr.bf16.mxu0 %v3609_v2 }
 0xad8   :  { %2849 = vmatpush1.bf16.msra.mxu0 %v3626_v8 }
 0xad9   :  { %2851 = vmatprep.subr.bf16.mxu0 %v3629_v9 }
 0xadc   :  { %2853 = vmatpush1.bf16.msra.mxu0 %v3646_v14 }
 0xadd   :  { %2855 = vmatprep.subr.bf16.mxu0 %v3649_v15 }
 0xae0   :  { %2857 = vmatpush1.bf16.msra.mxu0 %v3660_v18 }
 0xae1   :  { %2859 = vmatprep.subr.bf16.mxu0 %v3572_v52 }
 0xba6   :  { %v1080_v49 = vpop.f32.mrb[10].mxu0 }
 0xba7   :  { %v3056_v3 = vadd.f32 %v1080_v49, %v3697_v27  ;;  %v1082_v5 = vpop.f32.mrb[11].mxu0 }
 0xba8   :  { %v3057_v6 = vadd.f32 %v1082_v5, %v3701_v30  ;;  %v1322_v5 = vld [vmem:[%s4245_s7 + $0x50] sm:$0xff] }
 0xba9   :  { %3198 = vtanh.f32 %v3056_v3  ;;  %v1320_v3 = vld [vmem:[%s4245_s7 + $0x40] sm:$0xff] }
 0xbaa   :  { %3200 = vtanh.f32 %v3057_v6  ;;  %v2884_v6 = vpack.c.bf16 %v1322_v5, %v1320_v3  ;;  %v1669_v3 = vld [vmem:[%s4247_s9 + $0x58] sm:$0xff] }
 0xbb3   :  { %v3199_v7 = vpop.eup %3198 }
 0xbb4   :  { %v1089_v10 = vmul.f32 0.5, %v3199_v7  ;;  %v3201_v12 = vpop.eup %3200  ;;  %v1325_v7 = vld [vmem:[%s4245_s7 + $0x68] sm:$0xff] }
 0xbb5   :  { %v1090_v52 = vmul.f32 0.5, %v3201_v12 }
 0xbb6   :  { %v1091_v11 = vadd.f32 0.5, %v1089_v10  ;;  %v1327_v10 = vld [vmem:[%s4245_s7 + $0x78] sm:$0xff] }
 0xbb7   :  { %v1092_v22 = vadd.f32 0.5, %v1090_v52 }
 0xbb8   :  { %v1094_v13 = vmul.f32 %v3201_v12, %v1091_v11  ;;  %v1093_v16 = vmul.f32 %v1091_v11, %v1001_v29  ;;  %v1321_v29 = vld [vmem:[%s4245_s7 + $0x48] sm:$0xff]  ;;  %v1324_v11 = vld [vmem:[%s4245_s7 + $0x60] sm:$0xff]  ;;  %v2886_v12 = vpack.c.bf16 %v1327_v10, %v1325_v7  ;;  %v1668_v10 = vld [vmem:[%s4247_s9 + $0x50] sm:$0xff] }
 0xbb9   :  { %v2882_v39 = vpack.c.bf16 %v1323_v63, %v1321_v29  ;;  %v1665_v29 = vld [vmem:[%s4247_s9 + $0x38] sm:$0xff]  ;;  %v1666_v7 = vld [vmem:[%s4247_s9 + $0x40] sm:$0xff] }
 0xbba   :  { %1096 = vrot.lane.b32.xlu1 %v1094_v13, %s3337_s18  ;;  %v1326_v13 = vld [vmem:[%s4245_s7 + $0x70] sm:$0xff] }
 0xc2c   :  { %v1097_v17 = vpop.permute.xlu1 %1096 }
 0xc2d   :  { %v1099_v19 = vadd.f32 %v1097_v17, %v1093_v16  ;;  %v1466_v16 = vld [vmem:[%s4246_s8 + $0x8] sm:$0xff]  ;;  %v1468_v17 = vld [vmem:[%s4246_s8 + $0x18] sm:$0xff] }
 0xc2e   :  { %v2890_v52 = vpack.c.bf16 %v1468_v17, %v1466_v16  ;;  %v1670_v17 = vld [vmem:[%s4247_s9 + $0x60] sm:$0xff] }
 0xc2f   :  { %3202 = vtanh.f32 %v1099_v19 }
 0xc39   :  { %v3203_v25 = vpop.eup %3202 }
 0xc3a   :  { %v1101_v31 = vmul.f32 %v3203_v25, %v1092_v22 }
 0xc3c   :  { %1103 = vrot.lane.b32.xlu0 %v1101_v31, %s3337_s18 }
 0xcae   :  { %v1104_v32 = vpop.permute.xlu0 %1103 }
 0xcaf   :  { %1106 = vst.msk [vmem:[#allocation3 + $0x28] sm:$0xff] %vm63_vm0, %v1104_v32  ;;  %2670 = vmatmul.mubr.msk.f32.vlgmr.msra.gmra.mrb[12].mxu0 %vm515_vm1, %v1104_v32 }
 0xcb0   :  { %1107 = vst.msk [vmem:[#allocation3 + $0x10] sm:$0xff] %vm616_vm2, %v1104_v32  ;;  %2861 = vmatpush1.bf16.msra.mxu0 %v3607_v1  ;;  %1274 = vmatprep.mubr.f32.mxu0 %v3336_v4 }
 0xcb1   :  { %2863 = vmatprep.subr.bf16.mxu0 %v3609_v2 }
 0xcb4   :  { %2865 = vmatpush1.bf16.msra.mxu0 %v3626_v8 }
 0xcb5   :  { %2867 = vmatprep.subr.bf16.mxu0 %v3629_v9 }
 0xcb6   :  { %v1309_v58 = vld [vmem:[#allocation3 + $0x28] sm:$0xff] }
 0xcb8   :  { %2869 = vmatpush1.bf16.msra.mxu0 %v3646_v14 }
 0xcb9   :  { %2871 = vmatprep.subr.bf16.mxu0 %v3649_v15 }
 0xcbc   :  { %2873 = vmatpush1.bf16.msra.mxu0 %v3660_v18 }
 0xd82   :  { %v1178_v33 = vpop.f32.mrb[12].mxu0 }
 0xd83   :  { %v3058_v34 = vadd.f32 %v1178_v33, %v3697_v27  ;;  %v1180_v35 = vpop.f32.mrb[13].mxu0  ;;  %v2689_v33 = vld [vmem:[%s4240_s2 + $0x8] sm:$0xff]  ;;  %s3338_s2 = smov 32  }
 0xd84   :  { %v3059_v1 = vadd.f32 %v1180_v35, %v3701_v30  ;;  %v1465_v35 = vld [vmem:[%s4246_s8] sm:$0xff] }
 0xd85   :  { %3204 = vtanh.f32 %v3058_v34 }
 0xd86   :  { %3206 = vtanh.f32 %v3059_v1  ;;  %v1467_v1 = vld [vmem:[%s4246_s8 + $0x10] sm:$0xff] }
 0xd8f   :  { %v3205_v36 = vpop.eup %3204 }
 0xd90   :  { %v1187_v2 = vmul.f32 0.5, %v3205_v36  ;;  %v3207_v8 = vpop.eup %3206  ;;  %v1470_v36 = vld [vmem:[%s4246_s8 + $0x28] sm:$0xff] }
 0xd91   :  { %v1188_v18 = vmul.f32 0.5, %v3207_v8 }
 0xd92   :  { %v1189_v37 = vadd.f32 0.5, %v1187_v2  ;;  %v1472_v2 = vld [vmem:[%s4246_s8 + $0x38] sm:$0xff] }
 0xd93   :  { %v1190_v41 = vadd.f32 0.5, %v1188_v18  ;;  %v1476_v18 = vld [vmem:[%s4246_s8 + $0x58] sm:$0xff] }
 0xd94   :  { %v1192_v40 = vmul.f32 %v3207_v8, %v1189_v37  ;;  %v1191_v9 = vmul.f32 %v1189_v37, %v1099_v19  ;;  %v2888_v19 = vpack.c.bf16 %v1326_v13, %v1324_v11  ;;  %v2892_v37 = vpack.c.bf16 %v1467_v1, %v1465_v35  ;;  %v1671_v11 = vld [vmem:[%s4247_s9 + $0x68] sm:$0xff] }
 0xd95   :  { %v2894_v8 = vpack.c.bf16 %v1472_v2, %v1470_v36  ;;  %v3994_v13 = vpack.c.bf16 %v1668_v10, %v1666_v7 }
 0xd96   :  { %1194 = vrot.lane.b32.xlu1 %v1192_v40, %s3337_s18  ;;  %v1469_v40 = vld [vmem:[%s4246_s8 + $0x20] sm:$0xff] }
 0xe08   :  { %v1195_v14 = vpop.permute.xlu1 %1194 }
 0xe09   :  { %v1197_v15 = vadd.f32 %v1195_v14, %v1191_v9  ;;  %v1471_v9 = vld [vmem:[%s4246_s8 + $0x30] sm:$0xff] }
 0xe0b   :  { %3208 = vtanh.f32 %v1197_v15 }
 0xe15   :  { %v3209_v42 = vpop.eup %3208 }
 0xe16   :  { %v1199_v43 = vmul.f32 %v3209_v42, %v1190_v41  ;;  %v2896_v41 = vpack.c.bf16 %v1471_v9, %v1469_v40 }
 0xe18   :  { %1201 = vrot.lane.b32.xlu0 %v1199_v43, %s3337_s18  ;;  %v1473_v43 = vld [vmem:[%s4246_s8 + $0x40] sm:$0xff] }
 0xe8a   :  { %v1202_v44 = vpop.permute.xlu0 %1201 }
 0xe8b   :  { %1204 = vst.msk [vmem:[#allocation3 + $0x30] sm:$0xff] %vm63_vm0, %v1202_v44  ;;  %2671 = vmatmul.mubr.msk.f32.vlgmr.msra.gmra.mrb[14].mxu0 %vm515_vm1, %v1202_v44 }
 0xe8c   :  { %1205 = vst.msk [vmem:[#allocation3 + $0x8] sm:$0xff] %vm616_vm2, %v1202_v44  ;;  %v1475_v44 = vld [vmem:[%s4246_s8 + $0x50] sm:$0xff]  ;;  %2727 = vmatprep.mubr.msk.f32.mxu0 %vm3340_vm3, %v3336_v4 }
 0xe92   :  { %v1310_v59 = vld [vmem:[#allocation3 + $0x30] sm:$0xff] }
 0xf5e   :  { %v1276_v20 = vpop.f32.mrb[14].mxu0 }
 0xf5f   :  { %v3060_v45 = vadd.f32 %v1276_v20, %v3697_v27  ;;  %v1278_v46 = vpop.f32.mrb[15].mxu0  ;;  %v1315_v27 = vld [vmem:[%s4245_s7 + $0x18] sm:$0xff]  ;;  %v1305_v20 = vld [vmem:[#allocation3 + $0x8] sm:$0xff] }
 0xf60   :  { %v3061_v47 = vadd.f32 %v1278_v46, %v3701_v30  ;;  %v1312_v30 = vld [vmem:[%s4245_s7] sm:$0xff]  ;;  %v2874_v57 = vpack.c.bf16 %v1315_v27, %v1313_v56  ;;  %v1480_v46 = vld [vmem:[%s4246_s8 + $0x78] sm:$0xff] }
 0xf61   :  { %3210 = vtanh.f32 %v3060_v45  ;;  %v2876_v60 = vpack.c.bf16 %v1314_v28, %v1312_v30  ;;  %v1478_v45 = vld [vmem:[%s4246_s8 + $0x68] sm:$0xff]  ;;  %v1661_v56 = vld [vmem:[%s4247_s9 + $0x18] sm:$0xff]  ;;  %v1308_v28 = vld [vmem:[#allocation3 + $0x20] sm:$0xff] }
 0xf62   :  { %3212 = vtanh.f32 %v3061_v47  ;;  %2875 = vmatprep.subr.bf16.mxu1 %v2874_v57  ;;  %v2900_v47 = vpack.c.bf16 %v1475_v44, %v1473_v43  ;;  %v1307_v57 = vld [vmem:[#allocation3 + $0x18] sm:$0xff] }
 0xf63   :  { %2877 = vmatpush1.bf16.msra.mxu1 %v2876_v60 }
 0xf64   :  { %2879 = vmatprep.subr.bf16.mxu1 %v2878_v21  ;;  %v1658_v21 = vld [vmem:[%s4247_s9] sm:$0xff] }
 0xf65   :  { %v3955_v63 = vpack.c.bf16 %v1660_v61, %v1658_v21 }
 0xf67   :  { %2881 = vmatpush1.bf16.msra.mxu1 %v2880_v38  ;;  %v3957_v38 = vpack.c.bf16 %v1665_v29, %v1663_v62 }
 0xf68   :  { %2883 = vmatprep.subr.bf16.mxu1 %v2882_v39  ;;  %v1662_v39 = vld [vmem:[%s4247_s9 + $0x20] sm:$0xff] }
 0xf6b   :  { %v3211_v50 = vpop.eup %3210  ;;  %2885 = vmatpush1.bf16.msra.mxu1 %v2884_v6 }
 0xf6c   :  { %v1285_v51 = vmul.f32 0.5, %v3211_v50  ;;  %v3213_v54 = vpop.eup %3212  ;;  %2887 = vmatprep.subr.bf16.mxu1 %v2886_v12  ;;  %v2902_v50 = vpack.c.bf16 %v1480_v46, %v1478_v45  ;;  %v1673_v12 = vld [vmem:[%s4247_s9 + $0x78] sm:$0xff] }
 0xf6d   :  { %v1286_v22 = vmul.f32 0.5, %v3213_v54  ;;  %v3997_v16 = vpack.c.bf16 %v1673_v12, %v1671_v11 }
 0xf6e   :  { %v1287_v53 = vadd.f32 0.5, %v1285_v51  ;;  %v1477_v51 = vld [vmem:[%s4246_s8 + $0x60] sm:$0xff] }
 0xf6f   :  { %2889 = vmatpush1.bf16.msra.mxu1 %v2888_v19  ;;  %v1288_v25 = vadd.f32 0.5, %v1286_v22  ;;  %v1672_v19 = vld [vmem:[%s4247_s9 + $0x70] sm:$0xff]  ;;  %v2688_v22 = vld [vmem:[%s4261_s30 + $0x8] sm:$0xff] }
 0xf70   :  { %v1290_v55 = vmul.f32 %v3213_v54, %v1287_v53  ;;  %v1289_v0 = vmul.f32 %v1287_v53, %v1197_v15  ;;  %2891 = vmatprep.subr.bf16.mxu1 %v2890_v52  ;;  %v1474_v15 = vld [vmem:[%s4246_s8 + $0x48] sm:$0xff]  ;;  %v1479_v53 = vld [vmem:[%s4246_s8 + $0x70] sm:$0xff]  ;;  %v4008_v52 = vpack.c.bf16 %v1672_v19, %v1670_v17 }
 0xf71   :  { %v2898_v42 = vpack.c.bf16 %v1476_v18, %v1474_v15  ;;  %v1306_v54 = vld [vmem:[#allocation3 + $0x10] sm:$0xff]  ;;  %v2904_v27 = vpack.c.bf16 %v1479_v53, %v1477_v51 }
 0xf72   :  { %1292 = vrot.lane.b32.xlu1 %v1290_v55, %s3337_s18  ;;  %v1659_v55 = vld [vmem:[%s4247_s9 + $0x8] sm:$0xff] }
 0xf73   :  { %v3930_v30 = vpack.c.bf16 %v1661_v56, %v1659_v55 }
 0xf76   :  { %1759 = vrot.lane.b32.xlu1 %v2689_v33, %s3337_s18 }
 0xfe4   :  { %v1293_v48 = vpop.permute.xlu1 %1292 }
 0xfe5   :  { %v3838_v49 = vadd.f32 %v1293_v48, %v1289_v0  ;;  %v1664_v0 = vld [vmem:[%s4247_s9 + $0x30] sm:$0xff]  ;;  %v1667_v48 = vld [vmem:[%s4247_s9 + $0x48] sm:$0xff] }
 0xfe6   :  { %v3974_v5 = vpack.c.bf16 %v1664_v0, %v1662_v39  ;;  %v3977_v6 = vpack.c.bf16 %v1669_v3, %v1667_v48 }
 0xfe7   :  { %3214 = vtanh.f32 %v3838_v49 }
 0xff1   :  { %v3215_v31 = vpop.eup %3214 }
 0xff2   :  { %v3865_v32 = vmul.f32 %v3215_v31, %v1288_v25  ;;  %v1594_v25 = vld [vmem:[%s4248_s10] sm:$0x3] }
 0xff3   :  { %v4041_v31 = vrot.slane %v1594_v25, %v441_v24  ;;  %v4045_v33 = vrot.slane %v1594_v25, %v445_v26  ;;  %v1760_v24 = vpop.permute.xlu1 %1759 }
 0xff4   :  { %1299 = vrot.lane.b32.xlu0 %v3865_v32, %s3337_s18 }
0x1066   :  { %v1300_v34 = vpop.permute.xlu0 %1299 }
0x1067   :  { %1302 = vst.msk [vmem:[#allocation3 + $0x38] sm:$0xff] %vm63_vm0, %v1300_v34  ;;  %2436 = vst.msk [vmem:[#allocation6] sm:$0xff] %vm63_vm0, %v1300_v34 }
0x1068   :  { %1303 = vst.msk [vmem:[#allocation3] sm:$0xff] %vm616_vm2, %v1300_v34 }
0x106e   :  { %v1311_v60 = vld [vmem:[#allocation3 + $0x38] sm:$0xff] }
0x106f   :  { %v1304_v14 = vld [vmem:[#allocation3] sm:$0xff] }
0x1070   :  { %2672 = vmatmul.mubr.msk.f32.vlgmr.msra.gmra.mrb[0].mxu1 %vm515_vm1, %v1304_v14 }
0x1071   :  { %2893 = vmatpush1.bf16.msra.mxu1 %v2892_v37  ;;  %1422 = vmatprep.mubr.f32.mxu1 %v3336_v4 }
0x1072   :  { %2895 = vmatprep.subr.bf16.mxu1 %v2894_v8 }
0x1074   :  { %2673 = vmatmul.mubr.msk.f32.gmra.mrb[2].mxu1 %vm515_vm1, %v1305_v20 }
0x1075   :  { %1428 = vmatprep.mubr.f32.mxu1 %v3336_v4  ;;  %2897 = vmatpush1.bf16.msra.mxu1 %v2896_v41 }
0x1076   :  { %2899 = vmatprep.subr.bf16.mxu1 %v2898_v42 }
0x1078   :  { %2674 = vmatmul.mubr.msk.f32.gmra.mrb[4].mxu1 %vm515_vm1, %v1306_v54 }
0x1079   :  { %1434 = vmatprep.mubr.f32.mxu1 %v3336_v4  ;;  %2901 = vmatpush1.bf16.msra.mxu1 %v2900_v47 }
0x107a   :  { %2903 = vmatprep.subr.bf16.mxu1 %v2902_v50 }
0x107c   :  { %2675 = vmatmul.mubr.msk.f32.gmra.mrb[6].mxu1 %vm515_vm1, %v1307_v57 }
0x107d   :  { %1440 = vmatprep.mubr.f32.mxu1 %v3336_v4  ;;  %2905 = vmatpush1.bf16.msra.mxu1 %v2904_v27 }
0x107e   :  { %2907 = vmatprep.subr.bf16.mxu1 %v3930_v30 }
0x1080   :  { %2676 = vmatmul.mubr.msk.f32.gmra.mrb[8].mxu1 %vm515_vm1, %v1308_v28 }
0x1081   :  { %1446 = vmatprep.mubr.f32.mxu1 %v3336_v4 }
0x1084   :  { %2677 = vmatmul.mubr.msk.f32.gmra.mrb[10].mxu1 %vm515_vm1, %v1309_v58 }
0x1085   :  { %1452 = vmatprep.mubr.f32.mxu1 %v3336_v4 }
0x1088   :  { %2678 = vmatmul.mubr.msk.f32.gmra.mrb[12].mxu1 %vm515_vm1, %v1310_v59 }
0x1089   :  { %1458 = vmatprep.mubr.f32.mxu1 %v3336_v4 }
0x108c   :  { %2679 = vmatmul.mubr.msk.f32.gmra.mrb[14].mxu1 %vm515_vm1, %v1311_v60 }
0x108d   :  { %1545 = vmatprep.mubr.f32.mxu1 %v3336_v4 }
0x1094   :  { %2680 = vmatmul.mubr.msk.f32.vlgmr.msra.gmra.mrb[14].mxu1 %vm515_vm1, %v1304_v14 }
0x1095   :  { %2909 = vmatpush1.bf16.msra.mxu1 %v3955_v63  ;;  %1551 = vmatprep.mubr.f32.mxu1 %v3336_v4 }
0x1096   :  { %2911 = vmatprep.subr.bf16.mxu1 %v3957_v38 }
0x1098   :  { %2681 = vmatmul.mubr.msk.f32.gmra.mrb[12].mxu1 %vm515_vm1, %v1305_v20 }
0x1099   :  { %1557 = vmatprep.mubr.f32.mxu1 %v3336_v4  ;;  %2913 = vmatpush1.bf16.msra.mxu1 %v3974_v5 }
0x109a   :  { %2915 = vmatprep.subr.bf16.mxu1 %v3977_v6 }
0x109c   :  { %2682 = vmatmul.mubr.msk.f32.gmra.mrb[10].mxu1 %vm515_vm1, %v1306_v54 }
0x109d   :  { %1563 = vmatprep.mubr.f32.mxu1 %v3336_v4  ;;  %2917 = vmatpush1.bf16.msra.mxu1 %v3994_v13 }
0x109e   :  { %2919 = vmatprep.subr.bf16.mxu1 %v3997_v16 }
0x10a0   :  { %2683 = vmatmul.mubr.msk.f32.gmra.mrb[8].mxu1 %vm515_vm1, %v1307_v57 }
0x10a1   :  { %1569 = vmatprep.mubr.f32.mxu1 %v3336_v4  ;;  %2921 = vmatpush1.bf16.msra.mxu1 %v4008_v52 }
0x10a2   :  { %2923 = vmatprep.subr.bf16.mxu1 %v3930_v30 }
0x10a4   :  { %2684 = vmatmul.mubr.msk.f32.gmra.mrb[6].mxu1 %vm515_vm1, %v1308_v28 }
0x10a5   :  { %1575 = vmatprep.mubr.f32.mxu1 %v3336_v4 }
0x10a8   :  { %2685 = vmatmul.mubr.msk.f32.gmra.mrb[4].mxu1 %vm515_vm1, %v1309_v58 }
0x10a9   :  { %1581 = vmatprep.mubr.f32.mxu1 %v3336_v4 }
0x10ac   :  { %2686 = vmatmul.mubr.msk.f32.gmra.mrb[2].mxu1 %vm515_vm1, %v1310_v59 }
0x10ad   :  { %1587 = vmatprep.mubr.f32.mxu1 %v3336_v4 }
0x10b0   :  { %2687 = vmatmul.mubr.msk.f32.gmra.mrb[0].mxu1 %vm515_vm1, %v1311_v60 }
0x10b1   :  { %1743 = vmatprep.mubr.f32.mxu1 %v3336_v4 }
0x10b8   :  { %2690 = vmatmul.mubr.msk.f32.vlgmr.msra.gmra.mrb[0].mxu1 %vm515_vm1, %v2688_v22 }
0x10b9   :  { %2925 = vmatpush1.bf16.msra.mxu1 %v3955_v63  ;;  %1842 = vmatprep.mubr.f32.mxu1 %v3336_v4 }
0x10ba   :  { %2927 = vmatprep.subr.bf16.mxu1 %v3957_v38 }
0x10bd   :  { %2929 = vmatpush1.bf16.msra.mxu1 %v3974_v5 }
0x10be   :  { %2931 = vmatprep.subr.bf16.mxu1 %v3977_v6 }
0x10c1   :  { %2933 = vmatpush1.bf16.msra.mxu1 %v3994_v13 }
0x10c2   :  { %2935 = vmatprep.subr.bf16.mxu1 %v3997_v16 }
0x10c5   :  { %2937 = vmatpush1.bf16.msra.mxu1 %v4008_v52 }
0x10c6   :  { %2939 = vmatprep.subr.bf16.mxu1 %v3930_v30 }
0x118b   :  { %v1745_v34 = vpop.f32.mrb[0].mxu1 }
0x118c   :  { %v3062_v35 = vadd.f32 %v1745_v34, %v4041_v31  ;;  %v1747_v1 = vpop.f32.mrb[1].mxu1 }
0x118d   :  { %v3063_v36 = vadd.f32 %v1747_v1, %v4045_v33 }
0x118e   :  { %3216 = vtanh.f32 %v3062_v35 }
0x118f   :  { %3218 = vtanh.f32 %v3063_v36 }
0x1198   :  { %v3217_v2 = vpop.eup %3216 }
0x1199   :  { %v1754_v37 = vmul.f32 0.5, %v3217_v2  ;;  %v3219_v40 = vpop.eup %3218 }
0x119a   :  { %v1755_v15 = vmul.f32 0.5, %v3219_v40 }
0x119b   :  { %v1756_v8 = vadd.f32 0.5, %v1754_v37 }
0x119c   :  { %v1757_v18 = vadd.f32 0.5, %v1755_v15 }
0x119d   :  { %v1763_v9 = vmul.f32 %v3219_v40, %v1756_v8  ;;  %v1762_v14 = vmul.f32 %v1760_v24, %v1756_v8 }
0x119f   :  { %1765 = vrot.lane.b32.xlu0 %v1763_v9, %s3337_s18 }
0x1211   :  { %v1766_v23 = vpop.permute.xlu0 %1765 }
0x1212   :  { %v1768_v26 = vadd.f32 %v1766_v23, %v1762_v14 }
0x1214   :  { %3220 = vtanh.f32 %v1768_v26 }
0x121e   :  { %v3221_v41 = vpop.eup %3220 }
0x121f   :  { %v1770_v42 = vmul.f32 %v3221_v41, %v1757_v18 }
0x1221   :  { %1774 = vrot.lane.b32.xlu1 %v1770_v42, %s3337_s18 }
0x1293   :  { %v1775_v43 = vpop.permute.xlu1 %1774 }
0x1294   :  { %2691 = vmatmul.mubr.msk.f32.vlgmr.msra.gmra.mrb[2].mxu1 %vm515_vm1, %v1775_v43 }
0x1295   :  { %2941 = vmatpush1.bf16.msra.mxu1 %v3955_v63  ;;  %1937 = vmatprep.mubr.f32.mxu1 %v3336_v4 }
0x1296   :  { %2943 = vmatprep.subr.bf16.mxu1 %v3957_v38 }
0x1299   :  { %2945 = vmatpush1.bf16.msra.mxu1 %v3974_v5 }
0x129a   :  { %2947 = vmatprep.subr.bf16.mxu1 %v3977_v6 }
0x129d   :  { %2949 = vmatpush1.bf16.msra.mxu1 %v3994_v13 }
0x129e   :  { %2951 = vmatprep.subr.bf16.mxu1 %v3997_v16 }
0x12a1   :  { %2953 = vmatpush1.bf16.msra.mxu1 %v4008_v52 }
0x12a2   :  { %2955 = vmatprep.subr.bf16.mxu1 %v3930_v30 }
0x1367   :  { %v1844_v44 = vpop.f32.mrb[2].mxu1 }
0x1368   :  { %v3064_v20 = vadd.f32 %v1844_v44, %v4041_v31  ;;  %v1846_v45 = vpop.f32.mrb[3].mxu1 }
0x1369   :  { %v3065_v46 = vadd.f32 %v1846_v45, %v4045_v33 }
0x136a   :  { %3222 = vtanh.f32 %v3064_v20 }
0x136b   :  { %3224 = vtanh.f32 %v3065_v46 }
0x1374   :  { %v3223_v47 = vpop.eup %3222 }
0x1375   :  { %v1853_v50 = vmul.f32 0.5, %v3223_v47  ;;  %v3225_v53 = vpop.eup %3224 }
0x1376   :  { %v1854_v57 = vmul.f32 0.5, %v3225_v53 }
0x1377   :  { %v1855_v51 = vadd.f32 0.5, %v1853_v50 }
0x1378   :  { %v1856_v28 = vadd.f32 0.5, %v1854_v57 }
0x1379   :  { %v1858_v54 = vmul.f32 %v3225_v53, %v1855_v51  ;;  %v1857_v55 = vmul.f32 %v1855_v51, %v1768_v26 }
0x137b   :  { %1860 = vrot.lane.b32.xlu0 %v1858_v54, %s3337_s18 }
0x13ed   :  { %v1861_v56 = vpop.permute.xlu0 %1860 }
0x13ee   :  { %v1863_v27 = vadd.f32 %v1861_v56, %v1857_v55 }
0x13f0   :  { %3226 = vtanh.f32 %v1863_v27 }
0x13fa   :  { %v3227_v58 = vpop.eup %3226 }
0x13fb   :  { %v1865_v59 = vmul.f32 %v3227_v58, %v1856_v28 }
0x13fd   :  { %1869 = vrot.lane.b32.xlu1 %v1865_v59, %s3337_s18 }
0x146f   :  { %v1870_v60 = vpop.permute.xlu1 %1869 }
0x1470   :  { %2692 = vmatmul.mubr.msk.f32.vlgmr.msra.gmra.mrb[4].mxu1 %vm515_vm1, %v1870_v60 }
0x1471   :  { %2957 = vmatpush1.bf16.msra.mxu1 %v3955_v63  ;;  %2032 = vmatprep.mubr.f32.mxu1 %v3336_v4 }
0x1472   :  { %2959 = vmatprep.subr.bf16.mxu1 %v3957_v38 }
0x1475   :  { %2961 = vmatpush1.bf16.msra.mxu1 %v3974_v5 }
0x1476   :  { %2963 = vmatprep.subr.bf16.mxu1 %v3977_v6 }
0x1479   :  { %2965 = vmatpush1.bf16.msra.mxu1 %v3994_v13 }
0x147a   :  { %2967 = vmatprep.subr.bf16.mxu1 %v3997_v16 }
0x147d   :  { %2969 = vmatpush1.bf16.msra.mxu1 %v4008_v52 }
0x147e   :  { %2971 = vmatprep.subr.bf16.mxu1 %v3930_v30 }
0x1543   :  { %v1939_v21 = vpop.f32.mrb[4].mxu1 }
0x1544   :  { %v3066_v61 = vadd.f32 %v1939_v21, %v4041_v31  ;;  %v1941_v62 = vpop.f32.mrb[5].mxu1 }
0x1545   :  { %v3067_v29 = vadd.f32 %v1941_v62, %v4045_v33 }
0x1546   :  { %3228 = vtanh.f32 %v3066_v61 }
0x1547   :  { %3230 = vtanh.f32 %v3067_v29 }
0x1550   :  { %v3229_v39 = vpop.eup %3228 }
0x1551   :  { %v1948_v0 = vmul.f32 0.5, %v3229_v39  ;;  %v3231_v3 = vpop.eup %3230 }
0x1552   :  { %v1949_v17 = vmul.f32 0.5, %v3231_v3 }
0x1553   :  { %v1950_v48 = vadd.f32 0.5, %v1948_v0 }
0x1554   :  { %v1951_v19 = vadd.f32 0.5, %v1949_v17 }
0x1555   :  { %v1953_v7 = vmul.f32 %v3231_v3, %v1950_v48  ;;  %v1952_v10 = vmul.f32 %v1950_v48, %v1863_v27 }
0x1557   :  { %1955 = vrot.lane.b32.xlu0 %v1953_v7, %s3337_s18 }
0x15c9   :  { %v1956_v11 = vpop.permute.xlu0 %1955 }
0x15ca   :  { %v1958_v12 = vadd.f32 %v1956_v11, %v1952_v10 }
0x15cc   :  { %3232 = vtanh.f32 %v1958_v12 }
0x15d6   :  { %v3233_v22 = vpop.eup %3232 }
0x15d7   :  { %v1960_v25 = vmul.f32 %v3233_v22, %v1951_v19 }
0x15d9   :  { %1964 = vrot.lane.b32.xlu1 %v1960_v25, %s3337_s18 }
0x164b   :  { %v1965_v34 = vpop.permute.xlu1 %1964 }
0x164c   :  { %2693 = vmatmul.mubr.msk.f32.vlgmr.msra.gmra.mrb[6].mxu1 %vm515_vm1, %v1965_v34 }
0x164d   :  { %2973 = vmatpush1.bf16.msra.mxu1 %v3955_v63  ;;  %2127 = vmatprep.mubr.f32.mxu1 %v3336_v4 }
0x164e   :  { %2975 = vmatprep.subr.bf16.mxu1 %v3957_v38 }
0x1651   :  { %2977 = vmatpush1.bf16.msra.mxu1 %v3974_v5 }
0x1652   :  { %2979 = vmatprep.subr.bf16.mxu1 %v3977_v6 }
0x1655   :  { %2981 = vmatpush1.bf16.msra.mxu1 %v3994_v13 }
0x1656   :  { %2983 = vmatprep.subr.bf16.mxu1 %v3997_v16 }
0x1659   :  { %2985 = vmatpush1.bf16.msra.mxu1 %v4008_v52 }
0x165a   :  { %2987 = vmatprep.subr.bf16.mxu1 %v3930_v30 }
0x171f   :  { %v2034_v35 = vpop.f32.mrb[6].mxu1 }
0x1720   :  { %v3068_v1 = vadd.f32 %v2034_v35, %v4041_v31  ;;  %v2036_v36 = vpop.f32.mrb[7].mxu1 }
0x1721   :  { %v3069_v2 = vadd.f32 %v2036_v36, %v4045_v33 }
0x1722   :  { %3234 = vtanh.f32 %v3068_v1 }
0x1723   :  { %3236 = vtanh.f32 %v3069_v2 }
0x172c   :  { %v3235_v37 = vpop.eup %3234 }
0x172d   :  { %v2043_v8 = vmul.f32 0.5, %v3235_v37  ;;  %v3237_v9 = vpop.eup %3236 }
0x172e   :  { %v2044_v15 = vmul.f32 0.5, %v3237_v9 }
0x172f   :  { %v2045_v40 = vadd.f32 0.5, %v2043_v8 }
0x1730   :  { %v2046_v18 = vadd.f32 0.5, %v2044_v15 }
0x1731   :  { %v2048_v24 = vmul.f32 %v3237_v9, %v2045_v40  ;;  %v2047_v14 = vmul.f32 %v2045_v40, %v1958_v12 }
0x1733   :  { %2050 = vrot.lane.b32.xlu0 %v2048_v24, %s3337_s18 }
0x17a5   :  { %v2051_v23 = vpop.permute.xlu0 %2050 }
0x17a6   :  { %v2053_v26 = vadd.f32 %v2051_v23, %v2047_v14 }
0x17a8   :  { %3238 = vtanh.f32 %v2053_v26 }
0x17b2   :  { %v3239_v41 = vpop.eup %3238 }
0x17b3   :  { %v2055_v42 = vmul.f32 %v3239_v41, %v2046_v18 }
0x17b5   :  { %2059 = vrot.lane.b32.xlu1 %v2055_v42, %s3337_s18 }
0x1827   :  { %v2060_v43 = vpop.permute.xlu1 %2059 }
0x1828   :  { %2694 = vmatmul.mubr.msk.f32.vlgmr.msra.gmra.mrb[8].mxu1 %vm515_vm1, %v2060_v43 }
0x1829   :  { %2989 = vmatpush1.bf16.msra.mxu1 %v3955_v63  ;;  %2222 = vmatprep.mubr.f32.mxu1 %v3336_v4 }
0x182a   :  { %2991 = vmatprep.subr.bf16.mxu1 %v3957_v38 }
0x182d   :  { %2993 = vmatpush1.bf16.msra.mxu1 %v3974_v5 }
0x182e   :  { %2995 = vmatprep.subr.bf16.mxu1 %v3977_v6 }
0x1831   :  { %2997 = vmatpush1.bf16.msra.mxu1 %v3994_v13 }
0x1832   :  { %2999 = vmatprep.subr.bf16.mxu1 %v3997_v16 }
0x1835   :  { %3001 = vmatpush1.bf16.msra.mxu1 %v4008_v52 }
0x1836   :  { %3003 = vmatprep.subr.bf16.mxu1 %v3930_v30 }
0x18fb   :  { %v2129_v44 = vpop.f32.mrb[8].mxu1 }
0x18fc   :  { %v3070_v20 = vadd.f32 %v2129_v44, %v4041_v31  ;;  %v2131_v45 = vpop.f32.mrb[9].mxu1 }
0x18fd   :  { %v3071_v46 = vadd.f32 %v2131_v45, %v4045_v33 }
0x18fe   :  { %3240 = vtanh.f32 %v3070_v20 }
0x18ff   :  { %3242 = vtanh.f32 %v3071_v46 }
0x1908   :  { %v3241_v47 = vpop.eup %3240 }
0x1909   :  { %v2138_v50 = vmul.f32 0.5, %v3241_v47  ;;  %v3243_v53 = vpop.eup %3242 }
0x190a   :  { %v2139_v57 = vmul.f32 0.5, %v3243_v53 }
0x190b   :  { %v2140_v51 = vadd.f32 0.5, %v2138_v50 }
0x190c   :  { %v2141_v28 = vadd.f32 0.5, %v2139_v57  ;;  %v2698_v57 = vld [vmem:[%s4249_s11] ss:$0 sm:$0xff] }
0x190d   :  { %v2143_v54 = vmul.f32 %v3243_v53, %v2140_v51  ;;  %v2142_v55 = vmul.f32 %v2140_v51, %v2053_v26 }
0x190f   :  { %2145 = vrot.lane.b32.xlu0 %v2143_v54, %s3337_s18 }
0x1981   :  { %v2146_v56 = vpop.permute.xlu0 %2145 }
0x1982   :  { %v2148_v27 = vadd.f32 %v2146_v56, %v2142_v55 }
0x1984   :  { %3244 = vtanh.f32 %v2148_v27 }
0x198e   :  { %v3245_v58 = vpop.eup %3244 }
0x198f   :  { %v2150_v59 = vmul.f32 %v3245_v58, %v2141_v28 }
0x1991   :  { %2154 = vrot.lane.b32.xlu1 %v2150_v59, %s3337_s18  ;;  %v2699_v59 = vld [vmem:[%s4250_s12] ss:$0 sm:$0xff] }
0x1a03   :  { %v2155_v60 = vpop.permute.xlu1 %2154 }
0x1a04   :  { %2695 = vmatmul.mubr.msk.f32.vlgmr.msra.gmra.mrb[10].mxu1 %vm515_vm1, %v2155_v60  ;;  %v2512_v60 = vld [vmem:[%s4251_s13] sm:$0xff] }
0x1a05   :  { %3005 = vmatpush1.bf16.msra.mxu1 %v3955_v63  ;;  %2317 = vmatprep.mubr.f32.mxu1 %v3336_v4 }
0x1a06   :  { %3007 = vmatprep.subr.bf16.mxu1 %v3957_v38 }
0x1a09   :  { %3009 = vmatpush1.bf16.msra.mxu1 %v3974_v5 }
0x1a0a   :  { %3011 = vmatprep.subr.bf16.mxu1 %v3977_v6 }
0x1a0d   :  { %3013 = vmatpush1.bf16.msra.mxu1 %v3994_v13 }
0x1a0e   :  { %3015 = vmatprep.subr.bf16.mxu1 %v3997_v16 }
0x1a11   :  { %3017 = vmatpush1.bf16.msra.mxu1 %v4008_v52 }
0x1a12   :  { %3019 = vmatprep.subr.bf16.mxu1 %v3930_v30 }
0x1ad7   :  { %v2224_v21 = vpop.f32.mrb[10].mxu1 }
0x1ad8   :  { %v3072_v61 = vadd.f32 %v2224_v21, %v4041_v31  ;;  %v2226_v62 = vpop.f32.mrb[11].mxu1  ;;  %v2513_v21 = vld [vmem:[%s4251_s13 + $0x8] sm:$0xff] }
0x1ad9   :  { %v3073_v29 = vadd.f32 %v2226_v62, %v4045_v33  ;;  %v3339_v62 = vmov 0.0|0.0  }
0x1ada   :  { %3246 = vtanh.f32 %v3072_v61  ;;  %v2514_v61 = vld [vmem:[%s4251_s13 + $0x10] sm:$0xff]  ;;  %3034 = vmatprep.subr.bf16.mxu0 %v3339_v62 }
0x1adb   :  { %3248 = vtanh.f32 %v3073_v29  ;;  %v3035_v29 = vpack.c.bf16 %v2513_v21, %v2512_v60 }
0x1add   :  { %3036 = vmatpush3.bf16.msra.mxu0 %v3035_v29 }
0x1ade   :  { %3037 = vmatprep.subr.bf16.mxu0 %v3339_v62 }
0x1ae4   :  { %v3247_v39 = vpop.eup %3246 }
0x1ae5   :  { %v2233_v0 = vmul.f32 0.5, %v3247_v39  ;;  %v3249_v3 = vpop.eup %3248  ;;  %v2515_v39 = vld [vmem:[%s4251_s13 + $0x18] sm:$0xff] }
0x1ae6   :  { %v2234_v30 = vmul.f32 0.5, %v3249_v3 }
0x1ae7   :  { %v2235_v48 = vadd.f32 0.5, %v2233_v0  ;;  %v3038_v0 = vpack.c.bf16 %v2515_v39, %v2514_v61 }
0x1ae8   :  { %v2236_v17 = vadd.f32 0.5, %v2234_v30 }
0x1ae9   :  { %v2238_v7 = vmul.f32 %v3249_v3, %v2235_v48  ;;  %v2237_v10 = vmul.f32 %v2235_v48, %v2148_v27  ;;  %v2516_v48 = vld [vmem:[%s4251_s13 + $0x20] sm:$0xff]  ;;  %v2517_v3 = vld [vmem:[%s4251_s13 + $0x28] sm:$0xff]  ;;  %3039 = vmatpush3.bf16.msra.mxu0 %v3038_v0 }
0x1aea   :  { %3040 = vmatprep.subr.bf16.mxu0 %v3339_v62 }
0x1aeb   :  { %2240 = vrot.lane.b32.xlu0 %v2238_v7, %s3337_s18  ;;  %v3041_v7 = vpack.c.bf16 %v2517_v3, %v2516_v48 }
0x1aed   :  { %3042 = vmatpush3.bf16.msra.mxu0 %v3041_v7 }
0x1aee   :  { %3043 = vmatprep.subr.bf16.mxu0 %v3339_v62 }
0x1b5d   :  { %v2241_v11 = vpop.permute.xlu0 %2240 }
0x1b5e   :  { %v2243_v12 = vadd.f32 %v2241_v11, %v2237_v10  ;;  %v2518_v10 = vld [vmem:[%s4251_s13 + $0x30] sm:$0xff] }
0x1b60   :  { %3250 = vtanh.f32 %v2243_v12 }
0x1b6a   :  { %v3251_v19 = vpop.eup %3250 }
0x1b6b   :  { %v2245_v22 = vmul.f32 %v3251_v19, %v2236_v17 }
0x1b6d   :  { %2249 = vrot.lane.b32.xlu1 %v2245_v22, %s3337_s18 }
0x1bdf   :  { %v2250_v25 = vpop.permute.xlu1 %2249 }
0x1be0   :  { %2696 = vmatmul.mubr.msk.f32.vlgmr.msra.gmra.mrb[12].mxu1 %vm515_vm1, %v2250_v25 }
0x1be1   :  { %3021 = vmatpush1.bf16.msra.mxu1 %v3955_v63  ;;  %2412 = vmatprep.mubr.f32.mxu1 %v3336_v4  ;;  %v2519_v4 = vld [vmem:[%s4251_s13 + $0x38] sm:$0xff]  ;;  %s3341_s13 = smov [#allocation6]  }
0x1be2   :  { %3023 = vmatprep.subr.bf16.mxu1 %v3957_v38  ;;  %v3044_v11 = vpack.c.bf16 %v2519_v4, %v2518_v10  ;;  %s2618_s9 = sshll.u32 %s3341_s13, 4  ;;  %s2619_s9 = int_to_ptr.vmem [resolvable:$true] %s2618_s9 }
0x1be3   :  { %s3266_s21 = scalar_lea.vmem %s2619_s9, 512  ;;  %p3271_p1 = scmp.lt.s32.totalorder %s2619_s9, %s2619_s9 }
0x1be4   :  { %3045 = vmatpush3.bf16.msra.mxu0 %v3044_v11  ;;  %p3267_p0 = scmp.ne.s32.totalorder %s2619_s9, %s3266_s21  ;;  %p3272_p2 = scmp.lt.s32.totalorder %s3266_s21, %s3266_s21 }
0x1be5   :  { %3025 = vmatpush1.bf16.msra.mxu1 %v3974_v5 }
0x1be6   :  { %3027 = vmatprep.subr.bf16.mxu1 %v3977_v6  ;;  %p3273_p3 = por %p3272_p2, %p3271_p1 }
0x1be8   :  { %p3274_p4 = pnand %p3273_p3, %p3267_p0 }
0x1be9   :  { %3029 = vmatpush1.bf16.msra.mxu1 %v3994_v13 }
0x1bea   :  { %3031 = vmatprep.subr.bf16.mxu1 %v3997_v16 }
0x1bed   :  { %3033 = vmatpush1.bf16.msra.mxu1 %v4008_v52 }
0x1cb3   :  { %v2319_v34 = vpop.f32.mrb[12].mxu1 }
0x1cb4   :  { %v3074_v35 = vadd.f32 %v2319_v34, %v4041_v31  ;;  %v2321_v1 = vpop.f32.mrb[13].mxu1 }
0x1cb5   :  { %v3075_v63 = vadd.f32 %v2321_v1, %v4045_v33 }
0x1cb6   :  { %3252 = vtanh.f32 %v3074_v35 }
0x1cb7   :  { %3254 = vtanh.f32 %v3075_v63 }
0x1cc0   :  { %v3253_v36 = vpop.eup %3252 }
0x1cc1   :  { %v2328_v38 = vmul.f32 0.5, %v3253_v36  ;;  %v3255_v5 = vpop.eup %3254 }
0x1cc2   :  { %v2329_v52 = vmul.f32 0.5, %v3255_v5 }
0x1cc3   :  { %v2330_v2 = vadd.f32 0.5, %v2328_v38 }
0x1cc4   :  { %v2331_v8 = vadd.f32 0.5, %v2329_v52 }
0x1cc5   :  { %v2333_v37 = vmul.f32 %v3255_v5, %v2330_v2  ;;  %v2332_v6 = vmul.f32 %v2330_v2, %v2243_v12 }
0x1cc7   :  { %2335 = vrot.lane.b32.xlu0 %v2333_v37, %s3337_s18 }
0x1d39   :  { %v2336_v13 = vpop.permute.xlu0 %2335 }
0x1d3a   :  { %v2338_v16 = vadd.f32 %v2336_v13, %v2332_v6 }
0x1d3c   :  { %3256 = vtanh.f32 %v2338_v16 }
0x1d46   :  { %v3257_v40 = vpop.eup %3256 }
0x1d47   :  { %v2340_v9 = vmul.f32 %v3257_v40, %v2331_v8 }
0x1d49   :  { %2344 = vrot.lane.b32.xlu1 %v2340_v9, %s3337_s18 }
0x1dbb   :  { %v2345_v24 = vpop.permute.xlu1 %2344 }
0x1dbc   :  { %2697 = vmatmul.mubr.msk.f32.vlgmr.msra.gmra.mrb[14].mxu1 %vm515_vm1, %v2345_v24 }
0x1e8f   :  { %v2414_v14 = vpop.f32.mrb[14].mxu1 }
0x1e90   :  { %v3076_v23 = vadd.f32 %v2414_v14, %v4041_v31  ;;  %v2416_v26 = vpop.f32.mrb[15].mxu1 }
0x1e91   :  { %v3077_v15 = vadd.f32 %v2416_v26, %v4045_v33 }
0x1e92   :  { %3258 = vtanh.f32 %v3076_v23 }
0x1e93   :  { %3260 = vtanh.f32 %v3077_v15 }
0x1e9c   :  { %v3259_v18 = vpop.eup %3258 }
0x1e9d   :  { %v2423_v41 = vmul.f32 0.5, %v3259_v18  ;;  %v3261_v43 = vpop.eup %3260 }
0x1e9e   :  { %v2424_v47 = vmul.f32 0.5, %v3261_v43 }
0x1e9f   :  { %v2425_v42 = vadd.f32 0.5, %v2423_v41 }
0x1ea0   :  { %v2426_v31 = vadd.f32 0.5, %v2424_v47 }
0x1ea1   :  { %v2428_v44 = vmul.f32 %v3261_v43, %v2425_v42  ;;  %v2427_v20 = vmul.f32 %v2425_v42, %v2338_v16 }
0x1ea3   :  { %2430 = vrot.lane.b32.xlu0 %v2428_v44, %s3337_s18 }
0x1f15   :  { %v2431_v45 = vpop.permute.xlu0 %2430 }
0x1f16   :  { %v4138_v46 = vadd.f32 %v2431_v45, %v2427_v20 }
0x1f18   :  { %3262 = vtanh.f32 %v4138_v46 }
0x1f22   :  { %v3263_v50 = vpop.eup %3262 }
0x1f23   :  { %v2435_v51 = vmul.f32 %v3263_v50, %v2426_v31 }
0x1f25   :  { %2443 = vrot.lane.b32.xlu1 %v2435_v51, %s3337_s18 }
0x1f97   :  { %v2444_v33 = vpop.permute.xlu1 %2443 }
0x1f98   :  { %2447 = vst.msk [vmem:[#allocation6 + $0x10] sm:$0xff] %vm63_vm0, %v2444_v33  ;;  %v2474_v53 = vsel %vm515_vm1, %v2444_v33, 0.0 }
0x1f99   :  { %2475 = vadd.xlane.f32.xlu0 %v2474_v53 }
0x1faf   :  { %2498 = vrot.lane.b32.xlu0 %v2698_v57, %s3337_s18 }
0x2026   :  { %v2476_v54 = vpop.xlane.xlu0 %2475 }
0x2027   :  { %v2478_v55 = vmul.f32 0.015625, %v2476_v54 }
0x2029   :  { %v2479_v56 = vsub.f32 %v2435_v51, %v2478_v55 }
0x202a   :  { %v2499_v35 = vpop.permute.xlu0 %2498 }
0x202b   :  { %v2480_v27 = vmul.f32 %v2479_v56, %v2479_v56 }
0x202d   :  { %2482 = vrot.lane.b32.xlu1 %v2480_v27, %s3337_s18 }
0x209f   :  { %v2483_v28 = vpop.permute.xlu1 %2482 }
0x20a0   :  { %v2485_v58 = vsel %vm515_vm1, %v2483_v28, 0.0 }
0x20a1   :  { %2486 = vadd.xlane.f32.xlu1 %v2485_v58 }
0x20b2   :  { %2508 = vrot.lane.b32.xlu1 %v2699_v59, %s3337_s18 }
0x20b6   :  { %2448 = vrot.lane.b32.xlu1 %v2435_v51, %s3338_s2 }
0x20ba   :  { %2458 = vrot.lane.b32.xlu1 %v3838_v49, %s3338_s2 }
0x20be   :  { %2469 = vrot.lane.b32.xlu1 %v4138_v46, %s3338_s2 }
0x212e   :  { %v2487_v12 = vpop.xlane.xlu1 %2486 }
0x212f   :  { %v2488_v30 = vmul.f32 0.015625, %v2487_v12 }
0x2131   :  { %v2489_v17 = vadd.f32 0.001, %v2488_v30 }
0x2132   :  { %v2509_v19 = vpop.permute.xlu1 %2508 }
0x2133   :  { %3264 = vrsqrt.f32 %v2489_v17 }
0x2136   :  { %v2449_v22 = vpop.permute.xlu1 %2448 }
0x2137   :  { %2452 = vst.msk [vmem:[#allocation6 + $0x18] sm:$0xff] %vm63_vm0, %v2449_v22 }
0x213a   :  { %v2459_v25 = vpop.permute.xlu1 %2458 }
0x213b   :  { %2462 = vst.msk [vmem:[#allocation8 + $0x8] sm:$0xff] %vm63_vm0, %v2459_v25 }
0x213d   :  { %v3265_v34 = vpop.eup %3264 }
0x213e   :  { %v2470_v1 = vpop.permute.xlu1 %2469  ;;  %v2491_v63 = vmul.f32 %v3265_v34, %v2479_v56 }
0x213f   :  { %2473 = vst.msk [vmem:[#allocation8 + $0x18] sm:$0xff] %vm63_vm0, %v2470_v1 }
0x2140   :  { %v2501_v36 = vmul.f32 %v2499_v35, %v2491_v63 }
0x2142   :  { %v2511_v38 = vadd.f32 %v2509_v19, %v2501_v36 }
0x2144   :  { %2528 = vrot.lane.b32.xlu0 %v2511_v38, %s3337_s18 }
0x2148   :  { %2437 = vrot.lane.b32.xlu0 %v3865_v32, %s3338_s2 }
0x214c   :  { %2454 = vrot.lane.b32.xlu0 %v3838_v49, %s3337_s18 }
0x2150   :  { %2464 = vrot.lane.b32.xlu0 %v4138_v46, %s3337_s18 }
0x21b6   :  { %v2529_v2 = vpop.permute.xlu0 %2528 }
0x21b7   :  { %2728 = vmatmul.mubr.msk.f32.vlgmr.msra.gmra.mrb[16].mxu0 %vm515_vm1, %v2529_v2 }
0x21ba   :  { %v2438_v5 = vpop.permute.xlu0 %2437 }
0x21bb   :  { %2441 = vst.msk [vmem:[#allocation6 + $0x8] sm:$0xff] %vm63_vm0, %v2438_v5 }
0x21be   :  { %v2455_v37 = vpop.permute.xlu0 %2454 }
0x21bf   :  { %2457 = vst.msk [vmem:[#allocation8] sm:$0xff] %vm63_vm0, %v2455_v37 }
0x21c2   :  { %v2465_v6 = vpop.permute.xlu0 %2464 }
0x21c3   :  { %2468 = vst.msk [vmem:[#allocation8 + $0x10] sm:$0xff] %vm63_vm0, %v2465_v6 }
0x21c4   :  { %3277 = shalt.err (!%p3274_p4)
}
0x21c5   :  { %s3278_s22 = scalar_lea.hbm %s4254_s16, 512 }
0x21c6   :  { %p3279_p5 = scmp.ne.s32.totalorder %s4254_s16, %s3278_s22  ;;  %p3282_p6 = scmp.lt.u32.totalorder %s3278_s22, %s4254_s16 }
0x21c8   :  { %p3284_p7 = pnand %p3282_p6, %p3279_p5 }
0x21ca   :  { %3287 = shalt.err (!%p3284_p7)
}
0x21cb   :  { %s3342_s2 = smov 128   ;;  %s3343_s11 = smov 8  }
0x21cc   :  { %2624 = dma.vmem_to_hbm [thread:$0]  %s2619_s9, 512, %s4254_s16, [#allocation7], %s3342_s2, %s3342_s2, %s3343_s11  }
0x21cd   :  { %s3344_s28 = smov [#allocation8]  }
0x21ce   :  { %s2630_s12 = sshll.u32 %s3344_s28, 4  ;;  %s2631_s12 = int_to_ptr.vmem [resolvable:$true] %s2630_s12 }
0x21cf   :  { %s3288_s29 = scalar_lea.vmem %s2631_s12, 512  ;;  %p3293_p9 = scmp.lt.s32.totalorder %s2631_s12, %s2631_s12 }
0x21d0   :  { %p3289_p8 = scmp.ne.s32.totalorder %s2631_s12, %s3288_s29  ;;  %p3294_p10 = scmp.lt.s32.totalorder %s3288_s29, %s3288_s29 }
0x21d2   :  { %p3295_p11 = por %p3294_p10, %p3293_p9 }
0x21d4   :  { %p3296_p12 = pnand %p3295_p11, %p3289_p8 }
0x21d6   :  { %3299 = shalt.err (!%p3296_p12)
}
0x21d7   :  { %s3300_s8 = scalar_lea.hbm %s4255_s17, 512 }
0x21d8   :  { %p3301_p13 = scmp.ne.s32.totalorder %s4255_s17, %s3300_s8  ;;  %p3304_p0 = scmp.lt.u32.totalorder %s3300_s8, %s4255_s17 }
0x21da   :  { %p3306_p1 = pnand %p3304_p0, %p3301_p13 }
0x21dc   :  { %3309 = shalt.err (!%p3306_p1)
}
0x21dd   :  { %2636 = dma.vmem_to_hbm [thread:$0]  %s2631_s12, 512, %s4255_s17, [#allocation7], %s3342_s2, %s3342_s2, %s3343_s11  }
0x21de   :  { %v2700_v49 = vld [vmem:[%s4252_s14] ss:$0 sm:$0xff]  ;;  %s3345_s13 = smov [#allocation4]  }
0x21df   :  { %s2609_s9 = sshll.u32 %s3345_s13, 4  ;;  %s2610_s9 = int_to_ptr.vmem [resolvable:$true] %s2609_s9 }
0x21e0   :  { %s3310_s21 = scalar_lea.vmem %s2610_s9, 128  ;;  %p3315_p3 = scmp.lt.s32.totalorder %s2610_s9, %s2610_s9 }
0x21e1   :  { %p3311_p2 = scmp.ne.s32.totalorder %s2610_s9, %s3310_s21  ;;  %p3316_p4 = scmp.lt.s32.totalorder %s3310_s21, %s3310_s21 }
0x21e3   :  { %p3317_p5 = por %p3316_p4, %p3315_p3 }
0x21e5   :  { %p3318_p6 = pnand %p3317_p5, %p3311_p2 }
0x228a   :  { %v2598_v32 = vpop.f32.mrb[16].mxu0 }
0x228b   :  { %v2599_v13 = vadd.f32 %v2700_v49, %v2598_v32  ;;  %v2729_v16 = vpop.f32.mrb[17].mxu0 }
0x228d   :  { %2602 = vst.msk [vmem:[#allocation4] sm:$0xff] %vm63_vm0, %v2599_v13 }
0x228e   :  { %3321 = shalt.err (!%p3318_p6)
}
0x228f   :  { %s3322_s30 = scalar_lea.hbm %s4253_s15, 128 }
0x2290   :  { %p3323_p7 = scmp.ne.s32.totalorder %s4253_s15, %s3322_s30  ;;  %p3326_p8 = scmp.lt.u32.totalorder %s3322_s30, %s4253_s15 }
0x2292   :  { %p3328_p9 = pnand %p3326_p8, %p3323_p7 }
0x2294   :  { %3331 = shalt.err (!%p3328_p9)
}
0x2295   :  { %2612 = dma.vmem_to_hbm [thread:$0]  %s2610_s9, 128, %s4253_s15, [#allocation5]  }
0x2296   :  { %3332 = dma.done.wait [#allocation5], 128  }
0x2297   :  { %3333 = vsyncadd [#allocation5], 4294967168 }
0x2298   :  { %3334 = dma.done.wait [#allocation7], 1024  }
0x2299   :  { %3335 = vsyncadd [#allocation7], 4294966272 }
0x229a   :  { %2646 = vsyncpa [#allocation5], 1 }
0x229b   :  { %2647 = vsyncpa [#allocation7], 1 }

</bundles_post_ra>
